<compile_context>
chip_gen: v7x
topology: tpu7x:2x2x1
jax: 0.10.0
libtpu: 0.0.40
codegen_flags: <defaults>
</compile_context>

<pallas_src>
import functools

import jax
import jax.numpy as jnp
from jax.experimental import pallas as pl
from jax.experimental.pallas import tpu as pltpu


def meta_clf_kernel(d_ref, x_ref, w1b_ref, w2f_ref, g1_ref, g2_ref, g3_ref,
                    o_ref, *, compute_dtype):
    f32 = jnp.float32
    cdt = compute_dtype

    # coordinates (6, TN); on the bf16 path this is a no-op cast
    d = d_ref[...].astype(cdt)

    # fused encode_coords layer 1: kron(I3, w1) block-diagonal, one matmul
    h = jnp.maximum(jnp.dot(w1b_ref[...], d,
                            preferred_element_type=f32), 0.0)          # (48, TN)

    # fused encode layer 2 + double-Kronecker expansion: one (96,48) matmul,
    # then sublane-aligned 32-row slices for the a*b*c product.
    abc = jnp.dot(w2f_ref[...], h.astype(cdt),
                  preferred_element_type=f32)                           # (96, TN)
    e32 = abc[0:32] * abc[32:64] * abc[64:96]                           # (32, TN)
    # rows 27..31 are exact zeros (zero-padded weight rows); g1's matching
    # zero columns ignore them, so numerics equal the 27-channel product.

    # generate_filters: 27(->32) -> in_cs -> 2*in_cs -> in_cs (ReLU between)
    f = jnp.maximum(jnp.dot(g1_ref[...], e32.astype(cdt),
                            preferred_element_type=f32), 0.0)           # (C,  TN)
    f = jnp.maximum(jnp.dot(g2_ref[...], f.astype(cdt),
                            preferred_element_type=f32), 0.0)           # (2C, TN)
    f = jnp.dot(g3_ref[...], f.astype(cdt),
                preferred_element_type=f32)                             # (C,  TN)

    # (x * filters).sum over channels — f32 accumulation (v5e-safe VPU path)
    x = x_ref[...].astype(f32)
    o_ref[...] = jnp.sum(x * f, axis=0, keepdims=True).astype(o_ref.dtype)


def _fuse_weights(params, compute_dtype):
    """Precompute tiny fused weight matrices (host/XLA side, once)."""
    w1, w2, g1, g2, g3 = params
    f32 = jnp.float32
    w1 = w1.astype(f32)
    w2 = w2.astype(f32)
    in_cs = g1.shape[0]

    # encode layer 1: block-diagonal -> one (48, 6) matmul, no sublane slices of d
    w1b = jnp.kron(jnp.eye(3, dtype=f32), w1)                          # (48, 6)

    # encode layer 2 fused with the kron expansion:
    #   a[k] = xx[k // 9],  b[k] = yy[(k // 3) % 3],  c[k] = zz[k % 3]
    ea = jnp.repeat(w2, 9, axis=0)                                     # (27, 16)
    eb = jnp.tile(jnp.repeat(w2, 3, axis=0), (3, 1))                   # (27, 16)
    ec = jnp.tile(w2, (9, 1))                                          # (27, 16)
    z16 = jnp.zeros((27, 16), f32)
    w2a = jnp.concatenate([ea, z16, z16], axis=1)                      # reads h[0:16]
    w2b = jnp.concatenate([z16, eb, z16], axis=1)                      # reads h[16:32]
    w2c = jnp.concatenate([z16, z16, ec], axis=1)                      # reads h[32:48]
    # stack into one block matrix, each block zero-padded 27 -> 32 rows so the
    # result slices land on sublane-aligned offsets 0/32/64.
    pad5 = jnp.zeros((5, 48), f32)
    w2f = jnp.concatenate([w2a, pad5, w2b, pad5, w2c, pad5], axis=0)   # (96, 48)

    # pad g1 with 5 zero columns so it consumes the 32-row e-slice directly
    g1p = jnp.concatenate([g1.astype(f32), jnp.zeros((in_cs, 5), f32)], axis=1)

    dt = compute_dtype
    return (w1b.astype(dt), w2f.astype(dt), g1p.astype(dt),
            g2.astype(f32).astype(dt), g3.astype(f32).astype(dt))


def _pick_tn(hwd, in_cs, max_tn=4096):
    """Lane tile: largest 128-multiple <= ~8 MiB/step VMEM budget and <= 4096
    (v7x-safe), preferring an exact divisor of hwd with >=2 lane steps."""
    # generous per-lane f32-byte estimate: double-buffered d/x blocks, h, abc,
    # e32, the f chain and the output buffer
    per_lane_bytes = 4 * (2 * (6 + in_cs) + 48 + 96 + 32 + 4 * in_cs + 8)
    budget = 8 * 1024 * 1024
    cap = max(128, min(max_tn, (budget // per_lane_bytes) // 128 * 128))

    best = None
    t = 128
    while t <= min(cap, max(128, hwd // 2)):
        if hwd % t == 0:
            best = t
        t += 128
    if best is not None:
        return best
    # ragged volume: tile with a zero-padded tail (wrapper pads), keep >=2
    # lane steps where possible, never a single full-volume block.
    t = min(cap, max(128, ((pl.cdiv(hwd, 2) + 127) // 128) * 128))
    return max(128, t)


def meta_clf_pallas(x, d_all, params, *, tn=None, compute_dtype=None):
    bs, in_cs, H, W, D = x.shape
    hwd = H * W * D
    assert d_all.shape == (bs, 6, H, W, D)

    # bf16 matmul operands (f32 accumulate) when inputs are bf16; f32-exact
    # otherwise.  Can be forced via compute_dtype=jnp.bfloat16.
    if compute_dtype is None:
        compute_dtype = jnp.bfloat16 if x.dtype == jnp.bfloat16 else jnp.float32

    w1b, w2f, g1p, g2, g3 = _fuse_weights(params, compute_dtype)

    # Reshape only (free) — no HBM-rewriting transposes around a mem-bound kernel.
    xf = x.reshape(bs, in_cs, hwd)
    df = d_all.reshape(bs, 6, hwd)

    if tn is None:
        tn = _pick_tn(hwd, in_cs)
    hwd_pad = pl.cdiv(hwd, tn) * tn
    if hwd_pad != hwd:
        pad = ((0, 0), (0, 0), (0, hwd_pad - hwd))
        xf = jnp.pad(xf, pad)     # zero-padded tail: padded outputs are sliced off
        df = jnp.pad(df, pad)

    grid = (bs, hwd_pad // tn)

    def vox_spec(c):
        return pl.BlockSpec((None, c, tn), lambda b, i: (b, 0, i))

    def w_spec(a):
        return pl.BlockSpec(a.shape, lambda b, i: (0, 0))

    kern = functools.partial(meta_clf_kernel, compute_dtype=compute_dtype)

    out = pl.pallas_call(
        kern,
        out_shape=jax.ShapeDtypeStruct((bs, 1, hwd_pad), x.dtype),
        grid_spec=pltpu.PrefetchScalarGridSpec(
            num_scalar_prefetch=0,
            grid=grid,
            in_specs=[
                vox_spec(6),          # d_all coordinates
                vox_spec(in_cs),      # x features
                w_spec(w1b), w_spec(w2f), w_spec(g1p), w_spec(g2), w_spec(g3),
            ],
            out_specs=pl.BlockSpec((None, 1, tn), lambda b, i: (b, 0, i)),
        ),
        compiler_params=pltpu.CompilerParams(
            dimension_semantics=("parallel", "parallel"),
            vmem_limit_bytes=32 * 1024 * 1024,    # v7x-safe (64 MiB physical)
        ),
    )(df, xf, w1b, w2f, g1p, g2, g3)

    if hwd_pad != hwd:
        out = out[:, :, :hwd]
    return out.reshape(bs, 1, H, W, D)


def meta_clf_reference(x, d_all, params):
    """Pure-JAX reference mirroring the PyTorch forward semantics."""
    w1, w2, g1, g2, g3 = params
    hi = jax.lax.Precision.HIGHEST

    def conv1(w, v):  # 1x1x1 conv, bias=False
        return jnp.einsum("oi,bihwd->bohwd", w, v, precision=hi)

    def encode(c):
        return conv1(w2, jnp.maximum(conv1(w1, c), 0.0))

    def kron(a, b):
        bs, c1, H, W, D = a.shape
        c2 = b.shape[1]
        o = a[:, :, None] * b[:, None, :]
        return o.reshape(bs, c1 * c2, H, W, D)

    xx = encode(d_all[:, 0:2])
    yy = encode(d_all[:, 2:4])
    zz = encode(d_all[:, 4:6])
    enc = kron(kron(xx, yy), zz)
    f = jnp.maximum(conv1(g1, enc), 0.0)
    f = jnp.maximum(conv1(g2, f), 0.0)
    f = conv1(g3, f)
    return jnp.sum(x * f, axis=1, keepdims=True)


def init_params(key, in_cs):
    ks = jax.random.split(key, 5)
    scale = 0.2
    w1 = scale * jax.random.normal(ks[0], (16, 2), jnp.float32)
    w2 = scale * jax.random.normal(ks[1], (3, 16), jnp.float32)
    g1 = scale * jax.random.normal(ks[2], (in_cs, 27), jnp.float32)
    g2 = scale * jax.random.normal(ks[3], (2 * in_cs, in_cs), jnp.float32)
    g3 = scale * jax.random.normal(ks[4], (in_cs, 2 * in_cs), jnp.float32)
    return (w1, w2, g1, g2, g3)


if __name__ == "__main__":
    key = jax.random.PRNGKey(0)
    k_x, k_d, k_p = jax.random.split(key, 3)

    bs, in_cs, H, W, D = 2, 4, 16, 16, 16
    x = jax.random.normal(k_x, (bs, in_cs, H, W, D), jnp.float32)
    d_all = jax.random.normal(k_d, (bs, 6, H, W, D), jnp.float32)
    params = init_params(k_p, in_cs)

    # f32-exact path (matches the PyTorch module semantics)
    out = jax.block_until_ready(meta_clf_pallas(x, d_all, params))
    ref = jax.block_until_ready(meta_clf_reference(x, d_all, params))
    assert out.shape == (bs, 1, H, W, D)
    assert jnp.allclose(out, ref, atol=1e-4, rtol=1e-4), "f32 mismatch vs reference"

    # bf16-input path: halves HBM input traffic AND runs bf16-operand matmuls
    # (f32 accumulate) on the bf16-native MXU.
    x16 = x.astype(jnp.bfloat16)
    d16 = d_all.astype(jnp.bfloat16)
    out16 = jax.block_until_ready(meta_clf_pallas(x16, d16, params))
    ref16 = meta_clf_reference(x16.astype(jnp.float32), d16.astype(jnp.float32), params)
    assert out16.dtype == jnp.bfloat16
    assert jnp.allclose(out16.astype(jnp.float32), ref16, atol=1e-2, rtol=1e-2), \
        "bf16 mismatch vs reference"

    # forced fast mode on f32 inputs (bf16 matmul operands, f32 storage)
    outf = jax.block_until_ready(
        meta_clf_pallas(x, d_all, params, compute_dtype=jnp.bfloat16))
    assert jnp.allclose(outf, ref, atol=2e-2, rtol=2e-2), \
        "forced-bf16 mismatch vs reference"

    print("KERNEL_OK")
</pallas_src>

<mosaic_0001>
module attributes {stable_mosaic.version = 11 : i64} {
  func.func @meta_clf_kernel(%arg0: i32, %arg1: i32, %arg2: memref<1x6x2048xf32, #tpu.memory_space<vmem>>, %arg3: memref<1x4x2048xf32, #tpu.memory_space<vmem>>, %arg4: memref<48x6xf32, #tpu.memory_space<vmem>>, %arg5: memref<96x48xf32, #tpu.memory_space<vmem>>, %arg6: memref<4x32xf32, #tpu.memory_space<vmem>>, %arg7: memref<8x4xf32, #tpu.memory_space<vmem>>, %arg8: memref<4x8xf32, #tpu.memory_space<vmem>>, %arg9: memref<1x1x2048xf32, #tpu.memory_space<vmem>>) attributes {dimension_semantics = [#tpu.dimension_semantics<parallel>, #tpu.dimension_semantics<parallel>], iteration_bounds = array<i64: 2, 2>, scalar_prefetch = 0 : i64, scratch_operands = 0 : i64, tpu.core_type = #tpu.core_type<tc>, window_params = [{transform_indices = @transform_0, window_bounds = array<i64: 1, 6, 2048>}, {transform_indices = @transform_1, window_bounds = array<i64: 1, 4, 2048>}, {pipeline_mode = #tpu.pipeline_mode<synchronous>, transform_indices = @transform_2, window_bounds = array<i64: 48, 6>}, {pipeline_mode = #tpu.pipeline_mode<synchronous>, transform_indices = @transform_3, window_bounds = array<i64: 96, 48>}, {pipeline_mode = #tpu.pipeline_mode<synchronous>, transform_indices = @transform_4, window_bounds = array<i64: 4, 32>}, {pipeline_mode = #tpu.pipeline_mode<synchronous>, transform_indices = @transform_5, window_bounds = array<i64: 8, 4>}, {pipeline_mode = #tpu.pipeline_mode<synchronous>, transform_indices = @transform_6, window_bounds = array<i64: 4, 8>}, {transform_indices = @transform_7, window_bounds = array<i64: 1, 1, 2048>}]} {
    %c0 = arith.constant 0 : index
    %c0_0 = arith.constant 0 : index
    %c0_1 = arith.constant 0 : index
    %0 = vector.load %arg2[%c0, %c0_0, %c0_1] : memref<1x6x2048xf32, #tpu.memory_space<vmem>>, vector<1x6x2048xf32>
    %1 = vector.shape_cast %0 : vector<1x6x2048xf32> to vector<6x2048xf32>
    %c0_2 = arith.constant 0 : index
    %c0_3 = arith.constant 0 : index
    %2 = vector.load %arg4[%c0_2, %c0_3] : memref<48x6xf32, #tpu.memory_space<vmem>>, vector<48x6xf32>
    %cst = arith.constant dense<0.000000e+00> : vector<48x2048xf32>
    %3 = tpu.matmul %2, %1, %cst {dimension_numbers = #tpu.dot_dimension_numbers<[1], [0], [0], [1], [0, 0, 1, 1], [], []>} : vector<48x6xf32>, vector<6x2048xf32>, vector<48x2048xf32> -> vector<48x2048xf32>
    %cst_4 = arith.constant 0.000000e+00 : f32
    %4 = vector.broadcast %cst_4 : f32 to vector<48x2048xf32>
    %5 = arith.maximumf %3, %4 : vector<48x2048xf32>
    %c0_5 = arith.constant 0 : index
    %c0_6 = arith.constant 0 : index
    %6 = vector.load %arg5[%c0_5, %c0_6] : memref<96x48xf32, #tpu.memory_space<vmem>>, vector<96x48xf32>
    %cst_7 = arith.constant dense<0.000000e+00> : vector<96x2048xf32>
    %7 = tpu.matmul %6, %5, %cst_7 {dimension_numbers = #tpu.dot_dimension_numbers<[1], [0], [0], [1], [0, 0, 1, 1], [], []>} : vector<96x48xf32>, vector<48x2048xf32>, vector<96x2048xf32> -> vector<96x2048xf32>
    %8 = vector.extract_strided_slice %7 {offsets = [0, 0], sizes = [32, 2048], strides = [1, 1]} : vector<96x2048xf32> to vector<32x2048xf32>
    %9 = vector.extract_strided_slice %7 {offsets = [32, 0], sizes = [32, 2048], strides = [1, 1]} : vector<96x2048xf32> to vector<32x2048xf32>
    %10 = arith.mulf %8, %9 : vector<32x2048xf32>
    %11 = vector.extract_strided_slice %7 {offsets = [64, 0], sizes = [32, 2048], strides = [1, 1]} : vector<96x2048xf32> to vector<32x2048xf32>
    %12 = arith.mulf %10, %11 : vector<32x2048xf32>
    %c0_8 = arith.constant 0 : index
    %c0_9 = arith.constant 0 : index
    %13 = vector.load %arg6[%c0_8, %c0_9] : memref<4x32xf32, #tpu.memory_space<vmem>>, vector<4x32xf32>
    %cst_10 = arith.constant dense<0.000000e+00> : vector<4x2048xf32>
    %14 = tpu.matmul %13, %12, %cst_10 {dimension_numbers = #tpu.dot_dimension_numbers<[1], [0], [0], [1], [0, 0, 1, 1], [], []>} : vector<4x32xf32>, vector<32x2048xf32>, vector<4x2048xf32> -> vector<4x2048xf32>
    %cst_11 = arith.constant 0.000000e+00 : f32
    %15 = vector.broadcast %cst_11 : f32 to vector<4x2048xf32>
    %16 = arith.maximumf %14, %15 : vector<4x2048xf32>
    %c0_12 = arith.constant 0 : index
    %c0_13 = arith.constant 0 : index
    %17 = vector.load %arg7[%c0_12, %c0_13] : memref<8x4xf32, #tpu.memory_space<vmem>>, vector<8x4xf32>
    %cst_14 = arith.constant dense<0.000000e+00> : vector<8x2048xf32>
    %18 = tpu.matmul %17, %16, %cst_14 {dimension_numbers = #tpu.dot_dimension_numbers<[1], [0], [0], [1], [0, 0, 1, 1], [], []>} : vector<8x4xf32>, vector<4x2048xf32>, vector<8x2048xf32> -> vector<8x2048xf32>
    %cst_15 = arith.constant 0.000000e+00 : f32
    %19 = vector.broadcast %cst_15 : f32 to vector<8x2048xf32>
    %20 = arith.maximumf %18, %19 : vector<8x2048xf32>
    %c0_16 = arith.constant 0 : index
    %c0_17 = arith.constant 0 : index
    %21 = vector.load %arg8[%c0_16, %c0_17] : memref<4x8xf32, #tpu.memory_space<vmem>>, vector<4x8xf32>
    %cst_18 = arith.constant dense<0.000000e+00> : vector<4x2048xf32>
    %22 = tpu.matmul %21, %20, %cst_18 {dimension_numbers = #tpu.dot_dimension_numbers<[1], [0], [0], [1], [0, 0, 1, 1], [], []>} : vector<4x8xf32>, vector<8x2048xf32>, vector<4x2048xf32> -> vector<4x2048xf32>
    %c0_19 = arith.constant 0 : index
    %c0_20 = arith.constant 0 : index
    %c0_21 = arith.constant 0 : index
    %23 = vector.load %arg3[%c0_19, %c0_20, %c0_21] : memref<1x4x2048xf32, #tpu.memory_space<vmem>>, vector<1x4x2048xf32>
    %24 = vector.shape_cast %23 : vector<1x4x2048xf32> to vector<4x2048xf32>
    %25 = arith.mulf %24, %22 : vector<4x2048xf32>
    %cst_22 = arith.constant dense<0.000000e+00> : vector<2048xf32>
    %26 = vector.multi_reduction <add>, %25, %cst_22 [0] : vector<4x2048xf32> to vector<2048xf32>
    %27 = vector.shape_cast %26 : vector<2048xf32> to vector<1x2048xf32>
    %c0_23 = arith.constant 0 : index
    %c0_24 = arith.constant 0 : index
    %c0_25 = arith.constant 0 : index
    %28 = vector.load %arg9[%c0_23, %c0_24, %c0_25] : memref<1x1x2048xf32, #tpu.memory_space<vmem>>, vector<1x1x2048xf32>
    %29 = vector.shape_cast %28 : vector<1x1x2048xf32> to vector<1x2048xf32>
    %30 = vector.shape_cast %27 : vector<1x2048xf32> to vector<1x1x2048xf32>
    tpu.vector_store %arg9[%c0_23, %c0_24, %c0_25], %30 {strides = array<i32>} : memref<1x1x2048xf32, #tpu.memory_space<vmem>>, vector<1x1x2048xf32>,
    return
  }
  func.func @transform_0(%arg0: i32, %arg1: i32) -> (i32, i32, i32) {
    %c0_i32 = arith.constant 0 : i32
    %c0_i32_0 = arith.constant 0 : i32
    return %arg0, %c0_i32, %arg1 : i32, i32, i32
  }
  func.func @transform_1(%arg0: i32, %arg1: i32) -> (i32, i32, i32) {
    %c0_i32 = arith.constant 0 : i32
    %c0_i32_0 = arith.constant 0 : i32
    return %arg0, %c0_i32, %arg1 : i32, i32, i32
  }
  func.func @transform_2(%arg0: i32, %arg1: i32) -> (i32, i32) {
    %c0_i32 = arith.constant 0 : i32
    %c0_i32_0 = arith.constant 0 : i32
    %c0_i32_1 = arith.constant 0 : i32
    return %c0_i32, %c0_i32_0 : i32, i32
  }
  func.func @transform_3(%arg0: i32, %arg1: i32) -> (i32, i32) {
    %c0_i32 = arith.constant 0 : i32
    %c0_i32_0 = arith.constant 0 : i32
    %c0_i32_1 = arith.constant 0 : i32
    return %c0_i32, %c0_i32_0 : i32, i32
  }
  func.func @transform_4(%arg0: i32, %arg1: i32) -> (i32, i32) {
    %c0_i32 = arith.constant 0 : i32
    %c0_i32_0 = arith.constant 0 : i32
    %c0_i32_1 = arith.constant 0 : i32
    return %c0_i32, %c0_i32_0 : i32, i32
  }
  func.func @transform_5(%arg0: i32, %arg1: i32) -> (i32, i32) {
    %c0_i32 = arith.constant 0 : i32
    %c0_i32_0 = arith.constant 0 : i32
    %c0_i32_1 = arith.constant 0 : i32
    return %c0_i32, %c0_i32_0 : i32, i32
  }
  func.func @transform_6(%arg0: i32, %arg1: i32) -> (i32, i32) {
    %c0_i32 = arith.constant 0 : i32
    %c0_i32_0 = arith.constant 0 : i32
    %c0_i32_1 = arith.constant 0 : i32
    return %c0_i32, %c0_i32_0 : i32, i32
  }
  func.func @transform_7(%arg0: i32, %arg1: i32) -> (i32, i32, i32) {
    %c0_i32 = arith.constant 0 : i32
    %c0_i32_0 = arith.constant 0 : i32
    return %arg0, %c0_i32, %arg1 : i32, i32, i32
  }
}

</mosaic_0001>

<bundles_post_ra>
// kernel: tpu_custom_call.1
= control target key start
LH: loop header
LB: loop body
LE: loop exit
PB: predicated region body
PF: predicated region fallthrough
CT: control target
= control target key end

     0   :  { %12 = vsyncpa [#allocation3], 0  ;;  %s6294_s0 = inlined_call_operand.vmem [shape: f32[2,6,4096], index: 0, kind: input, shape index: {}]   ;;  %s6295_s1 = inlined_call_operand.vmem [shape: f32[2,4,4096], index: 1, kind: input, shape index: {}]   ;;  %s6296_s2 = inlined_call_operand.vmem [shape: f32[48,6], index: 2, kind: input, shape index: {}]   ;;  %s6297_s3 = inlined_call_operand.vmem [shape: f32[96,48], index: 3, kind: input, shape index: {}]   ;;  %s6298_s4 = inlined_call_operand.vmem [shape: f32[4,32], index: 4, kind: input, shape index: {}]   ;;  %s6299_s5 = inlined_call_operand.vmem [shape: f32[8,4], index: 5, kind: input, shape index: {}]   ;;  %s6300_s6 = inlined_call_operand.vmem [shape: f32[4,8], index: 6, kind: input, shape index: {}]   ;;  %s6301_s7 = inlined_call_operand.hbm [shape: f32[2,1,4096], index: 7, kind: output, shape index: {}]  }
   0x1   :  { %14 = vsyncpa [#allocation3 + $0x1], 0  ;;  %s5417_s24 = smov 0   ;;  %s5419_s25 = smov 0  }
   0x2   :  { %s5421_s26 = smov 0   ;;  %s5423_s27 = smov 0  }
   0x3   :  { %s5425_s28 = smov 0   ;;  %s5427_s29 = smov 0  }
   0x4   :  { %s5429_s30 = smov 0   ;;  %s5431_s8 = smov 0  }
   0x5 LB: > { %s4827_s9 = sadd.s32 4294967295, %s5372_s8   ;;  %s4828_s10 = sadd.s32 4294967294, %s5372_s8   ;;  %s5372_s8 = sphi %s5431_s8, %s20_s8   ;;  %s5368_s30 = sphi %s5429_s30, %s6310_s30   ;;  %s5364_s29 = sphi %s5427_s29, %s6309_s29   ;;  %s5360_s28 = sphi %s5425_s28, %s6308_s28   ;;  %s5356_s27 = sphi %s5423_s27, %s6307_s27   ;;  %s5352_s26 = sphi %s5421_s26, %s6306_s26   ;;  %s5348_s25 = sphi %s5419_s25, %s6305_s25   ;;  %s5344_s24 = sphi %s5417_s24, %s6304_s24  }
   0x6   : > { %s29_s11 = sadd.s32 1, %s5364_s29  ;;  %s32_s12 = sadd.s32 1, %s5368_s30 }
   0x7   : > { %p30_p0 = scmp.ge.s32.totalorder %s29_s11, 2  ;;  %p212_p1 = scmp.ne.s32.totalorder %s5352_s26, %s5348_s25 }
   0x8   : > { %p213_p2 = scmp.eq.s32.totalorder %s4827_s9, 3  ;;  %p218_p5 = scmp.ne.s32.totalorder %s5348_s25, %s5344_s24 }
   0x9   : > { %s6312_s11 = smov (%p30_p0, %s29_s11), 0  ;;  %s6314_s12 = smov (!%p30_p0, %s32_s12), %s5368_s30 }
   0xa   : > { %s198_s13 = ssub.s32 %s5364_s29, %s6312_s11  ;;  %p5468_p3 = por %p213_p2, %p212_p1 }
   0xb   : > { %p34_p4 = scmp.ge.s32.totalorder %s6314_s12, 2  ;;  %p219_p6 = scmp.eq.s32.totalorder %s4828_s10, 3 }
   0xc   : > { %p4831_p7 = scmp.ge.s32.totalorder %s5372_s8, 1  ;;  %p278_p9 = scmp.lt.s32.totalorder %s5372_s8, 5 }
   0xd   : > { %s6316_s12 = smov (%p34_p4, %s6314_s12), 0  ;;  %p5477_p8 = por %p219_p6, %p218_p5 }
   0xe   : > { %s197_s16 = ssub.s32 %s5368_s30, %s6316_s12  ;;  %s202_s17 = sadd.s32 1, %s5352_s26 }
   0xf   : > { %s199_s18 = sor.u32 %s198_s13, %s197_s16  ;;  %p279_p10 = pnand %p4831_p7, %p278_p9 }
  0x10   : > { %p200_p11 = scmp.eq.s32.totalorder %s199_s18, 0  ;;  %s5489_s20 = sshll.u32 (!%p279_p10), %s5356_s27, 4  ;;  %v5374_v0 = vmov (!%p279_p10), 0.0   ;;  %vm385_vm0 = vcmask (!%p279_p10), 1045504   ;;  %v5508_v1 = vld [vmem:[%s6296_s2] sm:$0xff] (!%p279_p10)  ;;  %vm366_vm1 = vcmask (!%p279_p10), 48128  }
  0x11   : > { %282 = sbr.rel (%p279_p10) target bundleno = 1373 (0x55d), region = 48  ;;  %p324_p12 = scmp.lt.s32.totalorder (!%p279_p10), %s5360_s28, 1  ;;  %498 = vmatprep.mubr.f32.mxu0 (!%p279_p10), %v5374_v0  ;;  %599 = vmatprep.mubr.f32.mxu1 (!%p279_p10), %v5374_v0  ;;  %v5531_v10 = vld [vmem:[%s6296_s2 + $0x8] sm:$0xff] (!%p279_p10)  ;;  %v5548_v13 = vld [vmem:[%s6296_s2 + $0x10] sm:$0xff] (!%p279_p10)  ;;  %v5561_v14 = vld [vmem:[%s6296_s2 + $0x18] sm:$0xff] (!%p279_p10)  ;;  %vm1350_vm2 = vcmask (!%p279_p10), 392192  }
  0x12   : > { %s5486_s19 = scalar_select %p200_p11, %s5352_s26, %s202_s17  }
  0x13   : > { %p326_p13 = scmp.lt.s32.totalorder (!%p279_p10), %s5489_s20, 31  ;;  %v5572_v15 = vld [vmem:[%s6296_s2 + $0x20] sm:$0xff] (!%p279_p10)  ;;  %v5583_v16 = vld [vmem:[%s6296_s2 + $0x28] sm:$0xff] (!%p279_p10)  ;;  %vm2612_vm3 = vcmask (!%p279_p10), 261120   ;;  %vm3205_vm4 = vcmask (!%p279_p10), 1043456   ;;  %vm3201_vm5 = vcmask (!%p279_p10), 31744  }
  0x14   : > { %vm3839_vm6 = vcmask (!%p279_p10), 64512  }
  0x18   : > { %s325_s21 = scalar_select %p324_p12, %s5360_s28, 1 }
  0x19   : > { %s327_s22 = scalar_select %p326_p13, %s5489_s20, 31 }
  0x1a   : > { %s4834_s23 = sshll.u32 %s325_s21, 5 }
  0x1b   : > { %s5497_s9 = sadd.s32 %s4834_s23, %s327_s22 }
  0x1c   : > { %s4835_s10 = sshll.u32 %s5497_s9, 3  ;;  %s4838_s13 = sshll.u32 %s5497_s9, 2 }
  0x1d   : > { %s5503_s16 = scalar_lea.vmem %s6294_s0, %s4835_s10  ;;  %s6186_s18 = scalar_lea.vmem %s6295_s1, %s4838_s13 }
  0x1e   : > { %v345_v2 = vld [vmem:[%s5503_s16 + $0x8] sm:$0x3f]  ;;  %v347_v3 = vld [vmem:[%s5503_s16 + $0x18] sm:$0x3f]  ;;  %v344_v4 = vld [vmem:[%s5503_s16] sm:$0x3f] }
  0x1f   : > { %4839 = vmatprep.subr.msk.mxu0 %vm385_vm0, %v345_v2  ;;  %4847 = vmatprep.subr.msk.mxu1 %vm385_vm0, %v347_v3  ;;  %v346_v5 = vld [vmem:[%s5503_s16 + $0x10] sm:$0x3f]  ;;  %v349_v6 = vld [vmem:[%s5503_s16 + $0x28] sm:$0x3f]  ;;  %v351_v7 = vld [vmem:[%s5503_s16 + $0x38] sm:$0x3f] }
  0x20   : > { %4840 = vmatpush1.msk.msra.mxu0 %vm385_vm0, %v344_v4  ;;  %4848 = vmatpush1.msk.msra.mxu1 %vm385_vm0, %v346_v5  ;;  %v348_v8 = vld [vmem:[%s5503_s16 + $0x20] sm:$0x3f]  ;;  %v350_v9 = vld [vmem:[%s5503_s16 + $0x30] sm:$0x3f]  ;;  %v353_v11 = vld [vmem:[%s5503_s16 + $0x48] sm:$0x3f] }
  0x21   : > { %4841 = vmatmul.mubr.msk.f32.vlgmr.msra.gmra.mrb[0].mxu0 %vm366_vm1, %v5508_v1  ;;  %4849 = vmatmul.mubr.msk.f32.vlgmr.msra.gmra.mrb[0].mxu1 %vm366_vm1, %v5508_v1  ;;  %v355_v12 = vld [vmem:[%s5503_s16 + $0x58] sm:$0x3f]  ;;  %v352_v17 = vld [vmem:[%s5503_s16 + $0x40] sm:$0x3f]  ;;  %v354_v18 = vld [vmem:[%s5503_s16 + $0x50] sm:$0x3f] }
  0x22   : > { %504 = vmatprep.mubr.f32.mxu0 %v5374_v0  ;;  %605 = vmatprep.mubr.f32.mxu1 %v5374_v0  ;;  %v357_v19 = vld [vmem:[%s5503_s16 + $0x68] sm:$0x3f]  ;;  %v359_v20 = vld [vmem:[%s5503_s16 + $0x78] sm:$0x3f]  ;;  %v356_v21 = vld [vmem:[%s5503_s16 + $0x60] sm:$0x3f] }
  0x23   : > { %4855 = vmatprep.subr.msk.mxu0 %vm385_vm0, %v349_v6  ;;  %4863 = vmatprep.subr.msk.mxu1 %vm385_vm0, %v351_v7  ;;  %v358_v22 = vld [vmem:[%s5503_s16 + $0x70] sm:$0x3f]  ;;  %s320_s9 = sand.u32 1, %s5348_s25   ;;  %s5041_s16 = sshll.u32 %s5360_s28, 5 }
  0x24   : > { %4856 = vmatpush1.msk.msra.mxu0 %vm385_vm0, %v348_v8  ;;  %4864 = vmatpush1.msk.msra.mxu1 %vm385_vm0, %v350_v9  ;;  %s4832_s21 = sshll.u32 %s320_s9, 4  ;;  %s4726_s23 = sadd.s32 %s5041_s16, %s5489_s20 }
  0x25   : > { %4842 = vmatmul.mubr.msk.f32.gmra.mrb[2].mxu0 %vm366_vm1, %v5531_v10  ;;  %4850 = vmatmul.mubr.msk.f32.gmra.mrb[2].mxu1 %vm366_vm1, %v5531_v10  ;;  %s6211_s22 = scalar_lea.vmem [#allocation2], %s4832_s21  ;;  %s5042_s10 = sshll.u32 %s4726_s23, 4 }
  0x26   : > { %510 = vmatprep.mubr.f32.mxu0 %v5374_v0  ;;  %611 = vmatprep.mubr.f32.mxu1 %v5374_v0  ;;  %s4730_s13 = sshll.u32 %s6211_s22, 4  ;;  %s6238_s28 = scalar_lea.hbm %s6301_s7, %s5042_s10  ;;  %s6240_s13 = int_to_ptr.vmem [resolvable:$true] %s4730_s13 }
  0x27   : > { %4871 = vmatprep.subr.msk.mxu0 %vm385_vm0, %v353_v11  ;;  %4879 = vmatprep.subr.msk.mxu1 %vm385_vm0, %v355_v12  ;;  %s4714_s20 = scalar_lea.sflag [#allocation3], %s320_s9  ;;  %s5376_s21 = smov [#allocation2]  }
  0x28   : > { %s5282_s16 = sshll.u32 %s5376_s21, 4  ;;  %s5283_s16 = int_to_ptr.vmem [resolvable:$false] %s5282_s16 }
  0x29   : > { %4843 = vmatmul.mubr.msk.f32.gmra.mrb[4].mxu0 %vm366_vm1, %v5548_v13  ;;  %4851 = vmatmul.mubr.msk.f32.gmra.mrb[4].mxu1 %vm366_vm1, %v5548_v13  ;;  %s5284_s23 = scalar_lea.vmem %s5283_s16, 512  ;;  %p5285_p4 = scmp.lt.s32.totalorder %s6240_s13, %s5283_s16 }
  0x2a   : > { %516 = vmatprep.mubr.f32.mxu0 %v5374_v0  ;;  %617 = vmatprep.mubr.f32.mxu1 %v5374_v0 }
  0x2d   : > { %4844 = vmatmul.mubr.msk.f32.gmra.mrb[6].mxu0 %vm366_vm1, %v5561_v14  ;;  %4852 = vmatmul.mubr.msk.f32.gmra.mrb[6].mxu1 %vm366_vm1, %v5561_v14 }
  0x2e   : > { %522 = vmatprep.mubr.f32.mxu0 %v5374_v0  ;;  %623 = vmatprep.mubr.f32.mxu1 %v5374_v0 }
  0x31   : > { %4845 = vmatmul.mubr.msk.f32.gmra.mrb[8].mxu0 %vm366_vm1, %v5572_v15  ;;  %4853 = vmatmul.mubr.msk.f32.gmra.mrb[8].mxu1 %vm366_vm1, %v5572_v15 }
  0x32   : > { %528 = vmatprep.mubr.f32.mxu0 %v5374_v0  ;;  %629 = vmatprep.mubr.f32.mxu1 %v5374_v0 }
  0x35   : > { %4846 = vmatmul.mubr.msk.f32.gmra.mrb[10].mxu0 %vm366_vm1, %v5583_v16  ;;  %4854 = vmatmul.mubr.msk.f32.gmra.mrb[10].mxu1 %vm366_vm1, %v5583_v16 }
  0x36   : > { %700 = vmatprep.mubr.f32.mxu0 %v5374_v0  ;;  %801 = vmatprep.mubr.f32.mxu1 %v5374_v0 }
  0x39   : > { %4857 = vmatmul.mubr.msk.f32.vlgmr.msra.gmra.mrb[12].mxu0 %vm366_vm1, %v5508_v1  ;;  %4865 = vmatmul.mubr.msk.f32.vlgmr.msra.gmra.mrb[12].mxu1 %vm366_vm1, %v5508_v1 }
  0x3a   : > { %706 = vmatprep.mubr.f32.mxu0 %v5374_v0  ;;  %807 = vmatprep.mubr.f32.mxu1 %v5374_v0 }
  0x3b   : > { %4872 = vmatpush1.msk.msra.mxu0 %vm385_vm0, %v352_v17  ;;  %4880 = vmatpush1.msk.msra.mxu1 %vm385_vm0, %v354_v18 }
  0x3c   : > { %4887 = vmatprep.subr.msk.mxu0 %vm385_vm0, %v357_v19  ;;  %4895 = vmatprep.subr.msk.mxu1 %vm385_vm0, %v359_v20 }
  0x3d   : > { %4858 = vmatmul.mubr.msk.f32.gmra.mrb[14].mxu0 %vm366_vm1, %v5531_v10  ;;  %4866 = vmatmul.mubr.msk.f32.gmra.mrb[14].mxu1 %vm366_vm1, %v5531_v10 }
  0x3e   : > { %712 = vmatprep.mubr.f32.mxu0 %v5374_v0  ;;  %813 = vmatprep.mubr.f32.mxu1 %v5374_v0 }
  0x41   : > { %4859 = vmatmul.mubr.msk.f32.gmra.mrb[16].mxu0 %vm366_vm1, %v5548_v13  ;;  %4867 = vmatmul.mubr.msk.f32.gmra.mrb[16].mxu1 %vm366_vm1, %v5548_v13 }
  0x42   : > { %718 = vmatprep.mubr.f32.mxu0 %v5374_v0  ;;  %819 = vmatprep.mubr.f32.mxu1 %v5374_v0 }
  0x45   : > { %4860 = vmatmul.mubr.msk.f32.gmra.mrb[18].mxu0 %vm366_vm1, %v5561_v14  ;;  %4868 = vmatmul.mubr.msk.f32.gmra.mrb[18].mxu1 %vm366_vm1, %v5561_v14 }
  0x46   : > { %724 = vmatprep.mubr.f32.mxu0 %v5374_v0  ;;  %825 = vmatprep.mubr.f32.mxu1 %v5374_v0 }
  0x49   : > { %4861 = vmatmul.mubr.msk.f32.gmra.mrb[20].mxu0 %vm366_vm1, %v5572_v15  ;;  %4869 = vmatmul.mubr.msk.f32.gmra.mrb[20].mxu1 %vm366_vm1, %v5572_v15 }
  0x4a   : > { %730 = vmatprep.mubr.f32.mxu0 %v5374_v0  ;;  %831 = vmatprep.mubr.f32.mxu1 %v5374_v0 }
  0x4d   : > { %4862 = vmatmul.mubr.msk.f32.gmra.mrb[22].mxu0 %vm366_vm1, %v5583_v16  ;;  %4870 = vmatmul.mubr.msk.f32.gmra.mrb[22].mxu1 %vm366_vm1, %v5583_v16 }
  0x4e   : > { %902 = vmatprep.mubr.f32.mxu0 %v5374_v0  ;;  %1003 = vmatprep.mubr.f32.mxu1 %v5374_v0 }
  0x51   : > { %4873 = vmatmul.mubr.msk.f32.vlgmr.msra.gmra.mrb[24].mxu0 %vm366_vm1, %v5508_v1  ;;  %4881 = vmatmul.mubr.msk.f32.vlgmr.msra.gmra.mrb[24].mxu1 %vm366_vm1, %v5508_v1 }
  0x52   : > { %908 = vmatprep.mubr.f32.mxu0 %v5374_v0  ;;  %1009 = vmatprep.mubr.f32.mxu1 %v5374_v0 }
  0x53   : > { %4888 = vmatpush1.msk.msra.mxu0 %vm385_vm0, %v356_v21  ;;  %4896 = vmatpush1.msk.msra.mxu1 %vm385_vm0, %v358_v22 }
  0x55   : > { %4874 = vmatmul.mubr.msk.f32.gmra.mrb[26].mxu0 %vm366_vm1, %v5531_v10  ;;  %4882 = vmatmul.mubr.msk.f32.gmra.mrb[26].mxu1 %vm366_vm1, %v5531_v10 }
  0x56   : > { %914 = vmatprep.mubr.f32.mxu0 %v5374_v0  ;;  %1015 = vmatprep.mubr.f32.mxu1 %v5374_v0 }
  0x59   : > { %4875 = vmatmul.mubr.msk.f32.gmra.mrb[28].mxu0 %vm366_vm1, %v5548_v13  ;;  %4883 = vmatmul.mubr.msk.f32.gmra.mrb[28].mxu1 %vm366_vm1, %v5548_v13 }
  0x5a   : > { %920 = vmatprep.mubr.f32.mxu0 %v5374_v0  ;;  %1021 = vmatprep.mubr.f32.mxu1 %v5374_v0 }
  0x5d   : > { %4876 = vmatmul.mubr.msk.f32.gmra.mrb[30].mxu0 %vm366_vm1, %v5561_v14  ;;  %4884 = vmatmul.mubr.msk.f32.gmra.mrb[30].mxu1 %vm366_vm1, %v5561_v14 }
  0x5e   : > { %926 = vmatprep.mubr.f32.mxu0 %v5374_v0  ;;  %1027 = vmatprep.mubr.f32.mxu1 %v5374_v0 }
  0x61   : > { %4877 = vmatmul.mubr.msk.f32.gmra.mrb[32].mxu0 %vm366_vm1, %v5572_v15  ;;  %4885 = vmatmul.mubr.msk.f32.gmra.mrb[32].mxu1 %vm366_vm1, %v5572_v15 }
  0x62   : > { %932 = vmatprep.mubr.f32.mxu0 %v5374_v0  ;;  %1033 = vmatprep.mubr.f32.mxu1 %v5374_v0 }
  0x65   : > { %4878 = vmatmul.mubr.msk.f32.gmra.mrb[34].mxu0 %vm366_vm1, %v5583_v16  ;;  %4886 = vmatmul.mubr.msk.f32.gmra.mrb[34].mxu1 %vm366_vm1, %v5583_v16 }
  0x66   : > { %1104 = vmatprep.mubr.f32.mxu0 %v5374_v0  ;;  %1205 = vmatprep.mubr.f32.mxu1 %v5374_v0 }
  0x69   : > { %4889 = vmatmul.mubr.msk.f32.vlgmr.msra.gmra.mrb[36].mxu0 %vm366_vm1, %v5508_v1  ;;  %4897 = vmatmul.mubr.msk.f32.vlgmr.msra.gmra.mrb[36].mxu1 %vm366_vm1, %v5508_v1 }
  0x6a   : > { %1110 = vmatprep.mubr.f32.mxu0 %v5374_v0  ;;  %1211 = vmatprep.mubr.f32.mxu1 %v5374_v0 }
  0x6d   : > { %4890 = vmatmul.mubr.msk.f32.gmra.mrb[38].mxu0 %vm366_vm1, %v5531_v10  ;;  %4898 = vmatmul.mubr.msk.f32.gmra.mrb[38].mxu1 %vm366_vm1, %v5531_v10 }
  0x6e   : > { %1116 = vmatprep.mubr.f32.mxu0 %v5374_v0  ;;  %1217 = vmatprep.mubr.f32.mxu1 %v5374_v0 }
  0x71   : > { %4891 = vmatmul.mubr.msk.f32.gmra.mrb[40].mxu0 %vm366_vm1, %v5548_v13  ;;  %4899 = vmatmul.mubr.msk.f32.gmra.mrb[40].mxu1 %vm366_vm1, %v5548_v13 }
  0x72   : > { %1122 = vmatprep.mubr.f32.mxu0 %v5374_v0  ;;  %1223 = vmatprep.mubr.f32.mxu1 %v5374_v0 }
  0x75   : > { %4892 = vmatmul.mubr.msk.f32.gmra.mrb[42].mxu0 %vm366_vm1, %v5561_v14  ;;  %4900 = vmatmul.mubr.msk.f32.gmra.mrb[42].mxu1 %vm366_vm1, %v5561_v14 }
  0x76   : > { %1128 = vmatprep.mubr.f32.mxu0 %v5374_v0  ;;  %1229 = vmatprep.mubr.f32.mxu1 %v5374_v0 }
  0x79   : > { %4893 = vmatmul.mubr.msk.f32.gmra.mrb[44].mxu0 %vm366_vm1, %v5572_v15  ;;  %4901 = vmatmul.mubr.msk.f32.gmra.mrb[44].mxu1 %vm366_vm1, %v5572_v15 }
  0x7a   : > { %1134 = vmatprep.mubr.f32.mxu0 %v5374_v0  ;;  %1235 = vmatprep.mubr.f32.mxu1 %v5374_v0 }
  0x7d   : > { %4894 = vmatmul.mubr.msk.f32.gmra.mrb[46].mxu0 %vm366_vm1, %v5583_v16  ;;  %4902 = vmatmul.mubr.msk.f32.gmra.mrb[46].mxu1 %vm366_vm1, %v5583_v16 }
  0x7e   : > { %1451 = vmatprep.mubr.f32.mxu0 %v5374_v0  ;;  %1588 = vmatprep.mubr.f32.mxu1 %v5374_v0 }
  0xf4   : > { %v500_v23 = vpop.f32.mrb[0].mxu0  ;;  %v601_v24 = vpop.f32.mrb[0].mxu1 }
  0xf5   : > { %v502_v25 = vpop.f32.mrb[1].mxu0  ;;  %v603_v26 = vpop.f32.mrb[1].mxu1  ;;  %v1242_v29 = vmax.f32 %v500_v23, 0.0  ;;  %v1244_v30 = vmax.f32 %v601_v24, 0.0 }
  0xf6   : > { %v1243_v35 = vmax.f32 %v502_v25, 0.0  ;;  %v1245_v36 = vmax.f32 %v603_v26, 0.0  ;;  %v5714_v26 = vld [vmem:[%s6297_s3] sm:$0xff] }
  0xf8   : > { %v506_v27 = vpop.f32.mrb[2].mxu0  ;;  %v607_v28 = vpop.f32.mrb[2].mxu1 }
  0xf9   : > { %v1258_v31 = vmax.f32 %v506_v27, 0.0  ;;  %v1260_v32 = vmax.f32 %v607_v28, 0.0  ;;  %v508_v33 = vpop.f32.mrb[3].mxu0  ;;  %v609_v34 = vpop.f32.mrb[3].mxu1 }
  0xfa   : > { %v1259_v37 = vmax.f32 %v508_v33, 0.0  ;;  %v1261_v38 = vmax.f32 %v609_v34, 0.0 }
  0xfb   : > { %v5047_v39 = vpack.c.bf16 %v1258_v31, %v1242_v29  ;;  %v5059_v40 = vpack.c.bf16 %v1260_v32, %v1244_v30 }
  0xfc   : > { %v5045_v41 = vpack.c.bf16 %v1259_v37, %v1243_v35  ;;  %v5057_v42 = vpack.c.bf16 %v1261_v38, %v1245_v36  ;;  %v512_v43 = vpop.f32.mrb[4].mxu0  ;;  %v613_v44 = vpop.f32.mrb[4].mxu1 }
  0xfd   : > { %v514_v45 = vpop.f32.mrb[5].mxu0  ;;  %v615_v46 = vpop.f32.mrb[5].mxu1  ;;  %v1274_v49 = vmax.f32 %v512_v43, 0.0  ;;  %v1276_v50 = vmax.f32 %v613_v44, 0.0 }
  0xfe   : > { %5046 = vmatprep.subr.bf16.mxu0 %v5045_v41  ;;  %5058 = vmatprep.subr.bf16.mxu1 %v5057_v42  ;;  %v1275_v55 = vmax.f32 %v514_v45, 0.0  ;;  %v1277_v56 = vmax.f32 %v615_v46, 0.0 }
  0xff   : > { %5048 = vmatpush1.bf16.msra.mxu0 %v5047_v39  ;;  %5060 = vmatpush1.bf16.msra.mxu1 %v5059_v40  ;;  %v5725_v39 = vld [vmem:[%s6297_s3 + $0x8] sm:$0xff] }
 0x100   : > { %v518_v47 = vpop.f32.mrb[6].mxu0  ;;  %v619_v48 = vpop.f32.mrb[6].mxu1 }
 0x101   : > { %v1290_v51 = vmax.f32 %v518_v47, 0.0  ;;  %v1292_v52 = vmax.f32 %v619_v48, 0.0  ;;  %v520_v53 = vpop.f32.mrb[7].mxu0  ;;  %v621_v54 = vpop.f32.mrb[7].mxu1  ;;  %v5734_v48 = vld [vmem:[%s6297_s3 + $0x10] sm:$0xff] }
 0x102   : > { %v1291_v57 = vmax.f32 %v520_v53, 0.0  ;;  %v1293_v58 = vmax.f32 %v621_v54, 0.0 }
 0x103   : > { %v5051_v59 = vpack.c.bf16 %v1290_v51, %v1274_v49  ;;  %v5063_v60 = vpack.c.bf16 %v1292_v52, %v1276_v50 }
 0x104   : > { %v5049_v61 = vpack.c.bf16 %v1291_v57, %v1275_v55  ;;  %v5061_v62 = vpack.c.bf16 %v1293_v58, %v1277_v56  ;;  %v524_v63 = vpop.f32.mrb[8].mxu0  ;;  %v625_v1 = vpop.f32.mrb[8].mxu1 }
 0x105   : > { %v526_v2 = vpop.f32.mrb[9].mxu0  ;;  %v627_v3 = vpop.f32.mrb[9].mxu1  ;;  %v1306_v6 = vmax.f32 %v524_v63, 0.0  ;;  %v1308_v7 = vmax.f32 %v625_v1, 0.0 }
 0x106   : > { %5050 = vmatprep.subr.bf16.mxu0 %v5049_v61  ;;  %5062 = vmatprep.subr.bf16.mxu1 %v5061_v62  ;;  %v1307_v12 = vmax.f32 %v526_v2, 0.0  ;;  %v1309_v13 = vmax.f32 %v627_v3, 0.0  ;;  %v5747_v61 = vld [vmem:[%s6297_s3 + $0x18] sm:$0xff] }
 0x107   : > { %5052 = vmatpush1.bf16.msra.mxu0 %v5051_v59  ;;  %5064 = vmatpush1.bf16.msra.mxu1 %v5063_v60 }
 0x108   : > { %v530_v4 = vpop.f32.mrb[10].mxu0  ;;  %v631_v5 = vpop.f32.mrb[10].mxu1 }
 0x109   : > { %v1322_v8 = vmax.f32 %v530_v4, 0.0  ;;  %v1324_v9 = vmax.f32 %v631_v5, 0.0  ;;  %v532_v10 = vpop.f32.mrb[11].mxu0  ;;  %v633_v11 = vpop.f32.mrb[11].mxu1  ;;  %v5756_v5 = vld [vmem:[%s6297_s3 + $0x20] sm:$0xff] }
 0x10a   : > { %v1323_v14 = vmax.f32 %v532_v10, 0.0  ;;  %v1325_v15 = vmax.f32 %v633_v11, 0.0 }
 0x10b   : > { %v5055_v16 = vpack.c.bf16 %v1322_v8, %v1306_v6  ;;  %v5067_v17 = vpack.c.bf16 %v1324_v9, %v1308_v7 }
 0x10c   : > { %v5053_v18 = vpack.c.bf16 %v1323_v14, %v1307_v12  ;;  %v5065_v19 = vpack.c.bf16 %v1325_v15, %v1309_v13  ;;  %v702_v20 = vpop.f32.mrb[12].mxu0  ;;  %v803_v21 = vpop.f32.mrb[12].mxu1 }
 0x10d   : > { %v704_v22 = vpop.f32.mrb[13].mxu0  ;;  %v805_v23 = vpop.f32.mrb[13].mxu1  ;;  %v1246_v24 = vmax.f32 %v702_v20, 0.0  ;;  %v1248_v25 = vmax.f32 %v803_v21, 0.0 }
 0x10e   : > { %5054 = vmatprep.subr.bf16.mxu0 %v5053_v18  ;;  %5066 = vmatprep.subr.bf16.mxu1 %v5065_v19  ;;  %v1247_v27 = vmax.f32 %v704_v22, 0.0  ;;  %v1249_v28 = vmax.f32 %v805_v23, 0.0  ;;  %v5769_v18 = vld [vmem:[%s6297_s3 + $0x28] sm:$0xff] }
 0x10f   : > { %5056 = vmatpush1.bf16.msra.mxu0 %v5055_v16  ;;  %5068 = vmatpush1.bf16.msra.mxu1 %v5067_v17 }
 0x110   : > { %v708_v29 = vpop.f32.mrb[14].mxu0  ;;  %v809_v30 = vpop.f32.mrb[14].mxu1 }
 0x111   : > { %v1262_v31 = vmax.f32 %v708_v29, 0.0  ;;  %v1264_v32 = vmax.f32 %v809_v30, 0.0  ;;  %v710_v33 = vpop.f32.mrb[15].mxu0  ;;  %v811_v34 = vpop.f32.mrb[15].mxu1 }
 0x112   : > { %v1263_v35 = vmax.f32 %v710_v33, 0.0  ;;  %v1265_v36 = vmax.f32 %v811_v34, 0.0  ;;  %4903 = vmatmul.mubr.msk.f32.vlgmr.msra.gmra.mrb[48].mxu0 %vm1350_vm2, %v5714_v26  ;;  %4915 = vmatmul.mubr.msk.f32.vlgmr.msra.gmra.mrb[48].mxu1 %vm1350_vm2, %v5714_v26 }
 0x113   : > { %v5071_v37 = vpack.c.bf16 %v1262_v31, %v1246_v24  ;;  %v5083_v38 = vpack.c.bf16 %v1264_v32, %v1248_v25  ;;  %1457 = vmatprep.mubr.f32.mxu0 %v5374_v0  ;;  %1594 = vmatprep.mubr.f32.mxu1 %v5374_v0 }
 0x114   : > { %v5069_v40 = vpack.c.bf16 %v1263_v35, %v1247_v27  ;;  %v5081_v41 = vpack.c.bf16 %v1265_v36, %v1249_v28  ;;  %v714_v42 = vpop.f32.mrb[16].mxu0  ;;  %v815_v43 = vpop.f32.mrb[16].mxu1  ;;  %v5780_v28 = vld [vmem:[%s6297_s3 + $0x30] sm:$0xff] }
 0x115   : > { %v716_v44 = vpop.f32.mrb[17].mxu0  ;;  %v817_v45 = vpop.f32.mrb[17].mxu1  ;;  %v1278_v46 = vmax.f32 %v714_v42, 0.0  ;;  %v1280_v47 = vmax.f32 %v815_v43, 0.0  ;;  %v5791_v42 = vld [vmem:[%s6297_s3 + $0x38] sm:$0xff] }
 0x116   : > { %4904 = vmatmul.mubr.msk.f32.gmra.mrb[50].mxu0 %vm1350_vm2, %v5725_v39  ;;  %4916 = vmatmul.mubr.msk.f32.gmra.mrb[50].mxu1 %vm1350_vm2, %v5725_v39  ;;  %v1279_v49 = vmax.f32 %v716_v44, 0.0  ;;  %v1281_v50 = vmax.f32 %v817_v45, 0.0 }
 0x117   : > { %5070 = vmatprep.subr.bf16.mxu0 %v5069_v40  ;;  %5082 = vmatprep.subr.bf16.mxu1 %v5081_v41 }
 0x118   : > { %5072 = vmatpush1.bf16.msra.mxu0 %v5071_v37  ;;  %5084 = vmatpush1.bf16.msra.mxu1 %v5083_v38  ;;  %v720_v51 = vpop.f32.mrb[18].mxu0  ;;  %v821_v52 = vpop.f32.mrb[18].mxu1 }
 0x119   : > { %1463 = vmatprep.mubr.f32.mxu0 %v5374_v0  ;;  %1600 = vmatprep.mubr.f32.mxu1 %v5374_v0  ;;  %v1294_v53 = vmax.f32 %v720_v51, 0.0  ;;  %v1296_v54 = vmax.f32 %v821_v52, 0.0  ;;  %v722_v55 = vpop.f32.mrb[19].mxu0  ;;  %v823_v56 = vpop.f32.mrb[19].mxu1  ;;  %v5806_v52 = vld [vmem:[%s6297_s3 + $0x40] sm:$0xff] }
 0x11a   : > { %4905 = vmatmul.mubr.msk.f32.gmra.mrb[52].mxu0 %vm1350_vm2, %v5734_v48  ;;  %4917 = vmatmul.mubr.msk.f32.gmra.mrb[52].mxu1 %vm1350_vm2, %v5734_v48  ;;  %v1295_v57 = vmax.f32 %v722_v55, 0.0  ;;  %v1297_v58 = vmax.f32 %v823_v56, 0.0 }
 0x11b   : > { %v5075_v59 = vpack.c.bf16 %v1294_v53, %v1278_v46  ;;  %v5087_v60 = vpack.c.bf16 %v1296_v54, %v1280_v47  ;;  %1469 = vmatprep.mubr.f32.mxu0 %v5374_v0  ;;  %1606 = vmatprep.mubr.f32.mxu1 %v5374_v0 }
 0x11c   : > { %v5073_v62 = vpack.c.bf16 %v1295_v57, %v1279_v49  ;;  %v5085_v63 = vpack.c.bf16 %v1297_v58, %v1281_v50  ;;  %v726_v1 = vpop.f32.mrb[20].mxu0  ;;  %v827_v2 = vpop.f32.mrb[20].mxu1 }
 0x11d   : > { %v728_v3 = vpop.f32.mrb[21].mxu0  ;;  %v829_v4 = vpop.f32.mrb[21].mxu1  ;;  %v1310_v6 = vmax.f32 %v726_v1, 0.0  ;;  %v1312_v7 = vmax.f32 %v827_v2, 0.0 }
 0x11e   : > { %4906 = vmatmul.mubr.msk.f32.gmra.mrb[54].mxu0 %vm1350_vm2, %v5747_v61  ;;  %4918 = vmatmul.mubr.msk.f32.gmra.mrb[54].mxu1 %vm1350_vm2, %v5747_v61  ;;  %v1311_v8 = vmax.f32 %v728_v3, 0.0  ;;  %v1313_v9 = vmax.f32 %v829_v4, 0.0  ;;  %v5817_v3 = vld [vmem:[%s6297_s3 + $0x48] sm:$0xff] }
 0x11f   : > { %5074 = vmatprep.subr.bf16.mxu0 %v5073_v62  ;;  %5086 = vmatprep.subr.bf16.mxu1 %v5085_v63 }
 0x120   : > { %1475 = vmatprep.mubr.f32.mxu0 %v5374_v0  ;;  %1612 = vmatprep.mubr.f32.mxu1 %v5374_v0  ;;  %v732_v10 = vpop.f32.mrb[22].mxu0  ;;  %v833_v11 = vpop.f32.mrb[22].mxu1 }
 0x121   : > { %5076 = vmatpush1.bf16.msra.mxu0 %v5075_v59  ;;  %5088 = vmatpush1.bf16.msra.mxu1 %v5087_v60  ;;  %v1326_v12 = vmax.f32 %v732_v10, 0.0  ;;  %v1328_v13 = vmax.f32 %v833_v11, 0.0  ;;  %v734_v14 = vpop.f32.mrb[23].mxu0  ;;  %v835_v15 = vpop.f32.mrb[23].mxu1 }
 0x122   : > { %4907 = vmatmul.mubr.msk.f32.gmra.mrb[56].mxu0 %vm1350_vm2, %v5756_v5  ;;  %4919 = vmatmul.mubr.msk.f32.gmra.mrb[56].mxu1 %vm1350_vm2, %v5756_v5  ;;  %v1327_v16 = vmax.f32 %v734_v14, 0.0  ;;  %v1329_v17 = vmax.f32 %v835_v15, 0.0 }
 0x123   : > { %1481 = vmatprep.mubr.f32.mxu0 %v5374_v0  ;;  %1618 = vmatprep.mubr.f32.mxu1 %v5374_v0  ;;  %v5079_v19 = vpack.c.bf16 %v1326_v12, %v1310_v6  ;;  %v5091_v20 = vpack.c.bf16 %v1328_v13, %v1312_v7  ;;  %v5836_v13 = vld [vmem:[%s6297_s3 + $0x50] sm:$0xff] }
 0x124   : > { %v5077_v21 = vpack.c.bf16 %v1327_v16, %v1311_v8  ;;  %v5089_v22 = vpack.c.bf16 %v1329_v17, %v1313_v9  ;;  %v904_v23 = vpop.f32.mrb[24].mxu0  ;;  %v1005_v24 = vpop.f32.mrb[24].mxu1 }
 0x125   : > { %v906_v25 = vpop.f32.mrb[25].mxu0  ;;  %v1007_v27 = vpop.f32.mrb[25].mxu1  ;;  %v1250_v29 = vmax.f32 %v904_v23, 0.0  ;;  %v1252_v30 = vmax.f32 %v1005_v24, 0.0 }
 0x126   : > { %4908 = vmatmul.mubr.msk.f32.gmra.mrb[58].mxu0 %vm1350_vm2, %v5769_v18  ;;  %4920 = vmatmul.mubr.msk.f32.gmra.mrb[58].mxu1 %vm1350_vm2, %v5769_v18  ;;  %v1251_v31 = vmax.f32 %v906_v25, 0.0  ;;  %v1253_v32 = vmax.f32 %v1007_v27, 0.0 }
 0x127   : > { %1487 = vmatprep.mubr.f32.mxu0 %v5374_v0  ;;  %1624 = vmatprep.mubr.f32.mxu1 %v5374_v0 }
 0x128   : > { %5078 = vmatprep.subr.bf16.mxu0 %v5077_v21  ;;  %5090 = vmatprep.subr.bf16.mxu1 %v5089_v22  ;;  %v910_v33 = vpop.f32.mrb[26].mxu0  ;;  %v1011_v34 = vpop.f32.mrb[26].mxu1 }
 0x129   : > { %5080 = vmatpush1.bf16.msra.mxu0 %v5079_v19  ;;  %5092 = vmatpush1.bf16.msra.mxu1 %v5091_v20  ;;  %v1266_v35 = vmax.f32 %v910_v33, 0.0  ;;  %v1268_v36 = vmax.f32 %v1011_v34, 0.0  ;;  %v912_v37 = vpop.f32.mrb[27].mxu0  ;;  %v1013_v38 = vpop.f32.mrb[27].mxu1 }
 0x12a   : > { %4909 = vmatmul.mubr.msk.f32.gmra.mrb[60].mxu0 %vm1350_vm2, %v5780_v28  ;;  %4921 = vmatmul.mubr.msk.f32.gmra.mrb[60].mxu1 %vm1350_vm2, %v5780_v28  ;;  %v1267_v40 = vmax.f32 %v912_v37, 0.0  ;;  %v1269_v41 = vmax.f32 %v1013_v38, 0.0 }
 0x12b   : > { %1493 = vmatprep.mubr.f32.mxu0 %v5374_v0  ;;  %1630 = vmatprep.mubr.f32.mxu1 %v5374_v0  ;;  %v5793_v43 = vpack.c.bf16 %v1266_v35, %v1250_v29  ;;  %v5795_v44 = vpack.c.bf16 %v1268_v36, %v1252_v30  ;;  %v5847_v29 = vld [vmem:[%s6297_s3 + $0x58] sm:$0xff] }
 0x12c   : > { %v5093_v45 = vpack.c.bf16 %v1267_v40, %v1251_v31  ;;  %v5105_v46 = vpack.c.bf16 %v1269_v41, %v1253_v32  ;;  %v916_v47 = vpop.f32.mrb[28].mxu0  ;;  %v1017_v49 = vpop.f32.mrb[28].mxu1 }
 0x12d   : > { %v918_v50 = vpop.f32.mrb[29].mxu0  ;;  %v1019_v51 = vpop.f32.mrb[29].mxu1  ;;  %v1282_v53 = vmax.f32 %v916_v47, 0.0  ;;  %v1284_v54 = vmax.f32 %v1017_v49, 0.0 }
 0x12e   : > { %4910 = vmatmul.mubr.msk.f32.gmra.mrb[62].mxu0 %vm1350_vm2, %v5791_v42  ;;  %4922 = vmatmul.mubr.msk.f32.gmra.mrb[62].mxu1 %vm1350_vm2, %v5791_v42  ;;  %v1283_v55 = vmax.f32 %v918_v50, 0.0  ;;  %v1285_v56 = vmax.f32 %v1019_v51, 0.0 }
 0x12f   : > { %1499 = vmatprep.mubr.f32.mxu0 %v5374_v0  ;;  %1636 = vmatprep.mubr.f32.mxu1 %v5374_v0 }
 0x130   : > { %5094 = vmatprep.subr.bf16.mxu0 %v5093_v45  ;;  %5106 = vmatprep.subr.bf16.mxu1 %v5105_v46  ;;  %v922_v57 = vpop.f32.mrb[30].mxu0  ;;  %v1023_v58 = vpop.f32.mrb[30].mxu1 }
 0x131   : > { %v1298_v59 = vmax.f32 %v922_v57, 0.0  ;;  %v1300_v60 = vmax.f32 %v1023_v58, 0.0  ;;  %v924_v62 = vpop.f32.mrb[31].mxu0  ;;  %v1025_v63 = vpop.f32.mrb[31].mxu1 }
 0x132   : > { %4911 = vmatmul.mubr.msk.f32.gmra.mrb[64].mxu0 %vm1350_vm2, %v5806_v52  ;;  %4923 = vmatmul.mubr.msk.f32.gmra.mrb[64].mxu1 %vm1350_vm2, %v5806_v52  ;;  %v1299_v1 = vmax.f32 %v924_v62, 0.0  ;;  %v1301_v2 = vmax.f32 %v1025_v63, 0.0 }
 0x133   : > { %1505 = vmatprep.mubr.f32.mxu0 %v5374_v0  ;;  %1642 = vmatprep.mubr.f32.mxu1 %v5374_v0  ;;  %v5819_v4 = vpack.c.bf16 %v1298_v59, %v1282_v53  ;;  %v5821_v6 = vpack.c.bf16 %v1300_v60, %v1284_v54 }
 0x134   : > { %v5823_v7 = vpack.c.bf16 %v1299_v1, %v1283_v55  ;;  %v5825_v8 = vpack.c.bf16 %v1301_v2, %v1285_v56  ;;  %v928_v9 = vpop.f32.mrb[32].mxu0  ;;  %v1029_v10 = vpop.f32.mrb[32].mxu1 }
 0x135   : > { %v930_v11 = vpop.f32.mrb[33].mxu0  ;;  %v1031_v12 = vpop.f32.mrb[33].mxu1  ;;  %v1314_v14 = vmax.f32 %v928_v9, 0.0  ;;  %v1316_v15 = vmax.f32 %v1029_v10, 0.0 }
 0x136   : > { %4912 = vmatmul.mubr.msk.f32.gmra.mrb[66].mxu0 %vm1350_vm2, %v5817_v3  ;;  %4924 = vmatmul.mubr.msk.f32.gmra.mrb[66].mxu1 %vm1350_vm2, %v5817_v3  ;;  %v1315_v16 = vmax.f32 %v930_v11, 0.0  ;;  %v1317_v17 = vmax.f32 %v1031_v12, 0.0 }
 0x137   : > { %1511 = vmatprep.mubr.f32.mxu0 %v5374_v0  ;;  %1648 = vmatprep.mubr.f32.mxu1 %v5374_v0 }
 0x138   : > { %v934_v19 = vpop.f32.mrb[34].mxu0  ;;  %v1035_v20 = vpop.f32.mrb[34].mxu1 }
 0x139   : > { %v1330_v21 = vmax.f32 %v934_v19, 0.0  ;;  %v1332_v22 = vmax.f32 %v1035_v20, 0.0  ;;  %v936_v23 = vpop.f32.mrb[35].mxu0  ;;  %v1037_v24 = vpop.f32.mrb[35].mxu1 }
 0x13a   : > { %4913 = vmatmul.mubr.msk.f32.gmra.mrb[68].mxu0 %vm1350_vm2, %v5836_v13  ;;  %4925 = vmatmul.mubr.msk.f32.gmra.mrb[68].mxu1 %vm1350_vm2, %v5836_v13  ;;  %v1331_v25 = vmax.f32 %v936_v23, 0.0  ;;  %v1333_v27 = vmax.f32 %v1037_v24, 0.0 }
 0x13b   : > { %1517 = vmatprep.mubr.f32.mxu0 %v5374_v0  ;;  %1654 = vmatprep.mubr.f32.mxu1 %v5374_v0  ;;  %v5849_v30 = vpack.c.bf16 %v1330_v21, %v1314_v14  ;;  %v5851_v31 = vpack.c.bf16 %v1332_v22, %v1316_v15 }
 0x13c   : > { %v5101_v32 = vpack.c.bf16 %v1331_v25, %v1315_v16  ;;  %v5113_v33 = vpack.c.bf16 %v1333_v27, %v1317_v17  ;;  %v1106_v34 = vpop.f32.mrb[36].mxu0  ;;  %v1207_v35 = vpop.f32.mrb[36].mxu1 }
 0x13d   : > { %v1108_v36 = vpop.f32.mrb[37].mxu0  ;;  %v1209_v37 = vpop.f32.mrb[37].mxu1  ;;  %v1254_v38 = vmax.f32 %v1106_v34, 0.0  ;;  %v1256_v40 = vmax.f32 %v1207_v35, 0.0 }
 0x13e   : > { %4914 = vmatmul.mubr.msk.f32.gmra.mrb[70].mxu0 %vm1350_vm2, %v5847_v29  ;;  %4926 = vmatmul.mubr.msk.f32.gmra.mrb[70].mxu1 %vm1350_vm2, %v5847_v29  ;;  %v1255_v41 = vmax.f32 %v1108_v36, 0.0  ;;  %v1257_v45 = vmax.f32 %v1209_v37, 0.0 }
 0x13f   : > { %1725 = vmatprep.mubr.f32.mxu0 %v5374_v0  ;;  %1862 = vmatprep.mubr.f32.mxu1 %v5374_v0 }
 0x140   : > { %v1112_v46 = vpop.f32.mrb[38].mxu0  ;;  %v1213_v47 = vpop.f32.mrb[38].mxu1 }
 0x141   : > { %v1270_v49 = vmax.f32 %v1112_v46, 0.0  ;;  %v1272_v50 = vmax.f32 %v1213_v47, 0.0  ;;  %v1114_v51 = vpop.f32.mrb[39].mxu0  ;;  %v1215_v53 = vpop.f32.mrb[39].mxu1 }
 0x142   : > { %4927 = vmatmul.mubr.msk.f32.vlgmr.msra.gmra.mrb[72].mxu0 %vm1350_vm2, %v5714_v26  ;;  %4939 = vmatmul.mubr.msk.f32.vlgmr.msra.gmra.mrb[72].mxu1 %vm1350_vm2, %v5714_v26  ;;  %v1271_v54 = vmax.f32 %v1114_v51, 0.0  ;;  %v1273_v55 = vmax.f32 %v1215_v53, 0.0 }
 0x143   : > { %5096 = vmatpush1.bf16.msra.mxu0 %v5793_v43  ;;  %5108 = vmatpush1.bf16.msra.mxu1 %v5795_v44  ;;  %v5865_v56 = vpack.c.bf16 %v1270_v49, %v1254_v38  ;;  %v5867_v57 = vpack.c.bf16 %v1272_v50, %v1256_v40 }
 0x144   : > { %1731 = vmatprep.mubr.f32.mxu0 %v5374_v0  ;;  %1868 = vmatprep.mubr.f32.mxu1 %v5374_v0  ;;  %v5117_v58 = vpack.c.bf16 %v1271_v54, %v1255_v41  ;;  %v5129_v59 = vpack.c.bf16 %v1273_v55, %v1257_v45  ;;  %v1118_v60 = vpop.f32.mrb[40].mxu0  ;;  %v1219_v62 = vpop.f32.mrb[40].mxu1 }
 0x145   : > { %5098 = vmatprep.subr.bf16.mxu0 %v5823_v7  ;;  %5110 = vmatprep.subr.bf16.mxu1 %v5825_v8  ;;  %v1120_v63 = vpop.f32.mrb[41].mxu0  ;;  %v1221_v43 = vpop.f32.mrb[41].mxu1  ;;  %v1286_v44 = vmax.f32 %v1118_v60, 0.0  ;;  %v1288_v1 = vmax.f32 %v1219_v62, 0.0 }
 0x146   : > { %4928 = vmatmul.mubr.msk.f32.gmra.mrb[74].mxu0 %vm1350_vm2, %v5725_v39  ;;  %4940 = vmatmul.mubr.msk.f32.gmra.mrb[74].mxu1 %vm1350_vm2, %v5725_v39  ;;  %v1287_v2 = vmax.f32 %v1120_v63, 0.0  ;;  %v1289_v7 = vmax.f32 %v1221_v43, 0.0 }
 0x147   : > { %1737 = vmatprep.mubr.f32.mxu0 %v5374_v0  ;;  %1874 = vmatprep.mubr.f32.mxu1 %v5374_v0 }
 0x148   : > { %5100 = vmatpush1.bf16.msra.mxu0 %v5819_v4  ;;  %5112 = vmatpush1.bf16.msra.mxu1 %v5821_v6  ;;  %v1124_v8 = vpop.f32.mrb[42].mxu0  ;;  %v1225_v9 = vpop.f32.mrb[42].mxu1 }
 0x149   : > { %5102 = vmatprep.subr.bf16.mxu0 %v5101_v32  ;;  %5114 = vmatprep.subr.bf16.mxu1 %v5113_v33  ;;  %v1302_v10 = vmax.f32 %v1124_v8, 0.0  ;;  %v1304_v11 = vmax.f32 %v1225_v9, 0.0  ;;  %v1126_v12 = vpop.f32.mrb[43].mxu0  ;;  %v1227_v14 = vpop.f32.mrb[43].mxu1 }
 0x14a   : > { %4929 = vmatmul.mubr.msk.f32.gmra.mrb[76].mxu0 %vm1350_vm2, %v5734_v48  ;;  %4941 = vmatmul.mubr.msk.f32.gmra.mrb[76].mxu1 %vm1350_vm2, %v5734_v48  ;;  %v1303_v15 = vmax.f32 %v1126_v12, 0.0  ;;  %v1305_v4 = vmax.f32 %v1227_v14, 0.0 }
 0x14b   : > { %1743 = vmatprep.mubr.f32.mxu0 %v5374_v0  ;;  %1880 = vmatprep.mubr.f32.mxu1 %v5374_v0  ;;  %v5887_v6 = vpack.c.bf16 %v1302_v10, %v1286_v44  ;;  %v5889_v16 = vpack.c.bf16 %v1304_v11, %v1288_v1 }
 0x14c   : > { %5104 = vmatpush1.bf16.msra.mxu0 %v5849_v30  ;;  %5116 = vmatpush1.bf16.msra.mxu1 %v5851_v31  ;;  %v5893_v17 = vpack.c.bf16 %v1303_v15, %v1287_v2  ;;  %v5895_v19 = vpack.c.bf16 %v1305_v4, %v1289_v7  ;;  %v1130_v20 = vpop.f32.mrb[44].mxu0  ;;  %v1231_v21 = vpop.f32.mrb[44].mxu1 }
 0x14d   : > { %5118 = vmatprep.subr.bf16.mxu0 %v5117_v58  ;;  %5130 = vmatprep.subr.bf16.mxu1 %v5129_v59  ;;  %v1132_v22 = vpop.f32.mrb[45].mxu0  ;;  %v1233_v23 = vpop.f32.mrb[45].mxu1  ;;  %v1318_v24 = vmax.f32 %v1130_v20, 0.0  ;;  %v1320_v25 = vmax.f32 %v1231_v21, 0.0 }
 0x14e   : > { %4930 = vmatmul.mubr.msk.f32.gmra.mrb[78].mxu0 %vm1350_vm2, %v5747_v61  ;;  %4942 = vmatmul.mubr.msk.f32.gmra.mrb[78].mxu1 %vm1350_vm2, %v5747_v61  ;;  %v1319_v27 = vmax.f32 %v1132_v22, 0.0  ;;  %v1321_v30 = vmax.f32 %v1233_v23, 0.0 }
 0x14f   : > { %1749 = vmatprep.mubr.f32.mxu0 %v5374_v0  ;;  %1886 = vmatprep.mubr.f32.mxu1 %v5374_v0 }
 0x150   : > { %v1136_v31 = vpop.f32.mrb[46].mxu0  ;;  %v1237_v32 = vpop.f32.mrb[46].mxu1 }
 0x151   : > { %v1334_v33 = vmax.f32 %v1136_v31, 0.0  ;;  %v1336_v34 = vmax.f32 %v1237_v32, 0.0  ;;  %v1138_v35 = vpop.f32.mrb[47].mxu0  ;;  %v1239_v36 = vpop.f32.mrb[47].mxu1 }
 0x152   : > { %4931 = vmatmul.mubr.msk.f32.gmra.mrb[80].mxu0 %vm1350_vm2, %v5756_v5  ;;  %4943 = vmatmul.mubr.msk.f32.gmra.mrb[80].mxu1 %vm1350_vm2, %v5756_v5  ;;  %v1335_v37 = vmax.f32 %v1138_v35, 0.0  ;;  %v1337_v38 = vmax.f32 %v1239_v36, 0.0 }
 0x153   : > { %1755 = vmatprep.mubr.f32.mxu0 %v5374_v0  ;;  %1892 = vmatprep.mubr.f32.mxu1 %v5374_v0  ;;  %v5127_v40 = vpack.c.bf16 %v1334_v33, %v1318_v24  ;;  %v5139_v41 = vpack.c.bf16 %v1336_v34, %v1320_v25 }
 0x154   : > { %v5125_v45 = vpack.c.bf16 %v1335_v37, %v1319_v27  ;;  %v5137_v46 = vpack.c.bf16 %v1337_v38, %v1321_v30 }
 0x156   : > { %4932 = vmatmul.mubr.msk.f32.gmra.mrb[82].mxu0 %vm1350_vm2, %v5769_v18  ;;  %4944 = vmatmul.mubr.msk.f32.gmra.mrb[82].mxu1 %vm1350_vm2, %v5769_v18 }
 0x157   : > { %1761 = vmatprep.mubr.f32.mxu0 %v5374_v0  ;;  %1898 = vmatprep.mubr.f32.mxu1 %v5374_v0 }
 0x15a   : > { %4933 = vmatmul.mubr.msk.f32.gmra.mrb[84].mxu0 %vm1350_vm2, %v5780_v28  ;;  %4945 = vmatmul.mubr.msk.f32.gmra.mrb[84].mxu1 %vm1350_vm2, %v5780_v28 }
 0x15b   : > { %1767 = vmatprep.mubr.f32.mxu0 %v5374_v0  ;;  %1904 = vmatprep.mubr.f32.mxu1 %v5374_v0 }
 0x15e   : > { %4934 = vmatmul.mubr.msk.f32.gmra.mrb[86].mxu0 %vm1350_vm2, %v5791_v42  ;;  %4946 = vmatmul.mubr.msk.f32.gmra.mrb[86].mxu1 %vm1350_vm2, %v5791_v42 }
 0x15f   : > { %1773 = vmatprep.mubr.f32.mxu0 %v5374_v0  ;;  %1910 = vmatprep.mubr.f32.mxu1 %v5374_v0 }
 0x162   : > { %4935 = vmatmul.mubr.msk.f32.gmra.mrb[88].mxu0 %vm1350_vm2, %v5806_v52  ;;  %4947 = vmatmul.mubr.msk.f32.gmra.mrb[88].mxu1 %vm1350_vm2, %v5806_v52 }
 0x163   : > { %1779 = vmatprep.mubr.f32.mxu0 %v5374_v0  ;;  %1916 = vmatprep.mubr.f32.mxu1 %v5374_v0 }
 0x166   : > { %4936 = vmatmul.mubr.msk.f32.gmra.mrb[90].mxu0 %vm1350_vm2, %v5817_v3  ;;  %4948 = vmatmul.mubr.msk.f32.gmra.mrb[90].mxu1 %vm1350_vm2, %v5817_v3 }
 0x167   : > { %1785 = vmatprep.mubr.f32.mxu0 %v5374_v0  ;;  %1922 = vmatprep.mubr.f32.mxu1 %v5374_v0 }
 0x16a   : > { %4937 = vmatmul.mubr.msk.f32.gmra.mrb[92].mxu0 %vm1350_vm2, %v5836_v13  ;;  %4949 = vmatmul.mubr.msk.f32.gmra.mrb[92].mxu1 %vm1350_vm2, %v5836_v13 }
 0x16b   : > { %1791 = vmatprep.mubr.f32.mxu0 %v5374_v0  ;;  %1928 = vmatprep.mubr.f32.mxu1 %v5374_v0 }
 0x16e   : > { %4938 = vmatmul.mubr.msk.f32.gmra.mrb[94].mxu0 %vm1350_vm2, %v5847_v29  ;;  %4950 = vmatmul.mubr.msk.f32.gmra.mrb[94].mxu1 %vm1350_vm2, %v5847_v29 }
 0x16f   : > { %1999 = vmatprep.mubr.f32.mxu0 %v5374_v0  ;;  %2136 = vmatprep.mubr.f32.mxu1 %v5374_v0 }
 0x172   : > { %4951 = vmatmul.mubr.msk.f32.vlgmr.msra.gmra.mrb[96].mxu0 %vm1350_vm2, %v5714_v26  ;;  %4963 = vmatmul.mubr.msk.f32.vlgmr.msra.gmra.mrb[96].mxu1 %vm1350_vm2, %v5714_v26 }
 0x173   : > { %5120 = vmatpush1.bf16.msra.mxu0 %v5865_v56  ;;  %5132 = vmatpush1.bf16.msra.mxu1 %v5867_v57 }
 0x174   : > { %2005 = vmatprep.mubr.f32.mxu0 %v5374_v0  ;;  %2142 = vmatprep.mubr.f32.mxu1 %v5374_v0 }
 0x175   : > { %5122 = vmatprep.subr.bf16.mxu0 %v5893_v17  ;;  %5134 = vmatprep.subr.bf16.mxu1 %v5895_v19 }
 0x176   : > { %4952 = vmatmul.mubr.msk.f32.gmra.mrb[98].mxu0 %vm1350_vm2, %v5725_v39  ;;  %4964 = vmatmul.mubr.msk.f32.gmra.mrb[98].mxu1 %vm1350_vm2, %v5725_v39 }
 0x177   : > { %2011 = vmatprep.mubr.f32.mxu0 %v5374_v0  ;;  %2148 = vmatprep.mubr.f32.mxu1 %v5374_v0 }
 0x178   : > { %5124 = vmatpush1.bf16.msra.mxu0 %v5887_v6  ;;  %5136 = vmatpush1.bf16.msra.mxu1 %v5889_v16 }
 0x179   : > { %5126 = vmatprep.subr.bf16.mxu0 %v5125_v45  ;;  %5138 = vmatprep.subr.bf16.mxu1 %v5137_v46 }
 0x17a   : > { %4953 = vmatmul.mubr.msk.f32.gmra.mrb[100].mxu0 %vm1350_vm2, %v5734_v48  ;;  %4965 = vmatmul.mubr.msk.f32.gmra.mrb[100].mxu1 %vm1350_vm2, %v5734_v48 }
 0x17b   : > { %2017 = vmatprep.mubr.f32.mxu0 %v5374_v0  ;;  %2154 = vmatprep.mubr.f32.mxu1 %v5374_v0 }
 0x17c   : > { %5128 = vmatpush1.bf16.msra.mxu0 %v5127_v40  ;;  %5140 = vmatpush1.bf16.msra.mxu1 %v5139_v41 }
 0x17e   : > { %4954 = vmatmul.mubr.msk.f32.gmra.mrb[102].mxu0 %vm1350_vm2, %v5747_v61  ;;  %4966 = vmatmul.mubr.msk.f32.gmra.mrb[102].mxu1 %vm1350_vm2, %v5747_v61 }
 0x17f   : > { %2023 = vmatprep.mubr.f32.mxu0 %v5374_v0  ;;  %2160 = vmatprep.mubr.f32.mxu1 %v5374_v0 }
 0x182   : > { %4955 = vmatmul.mubr.msk.f32.gmra.mrb[104].mxu0 %vm1350_vm2, %v5756_v5  ;;  %4967 = vmatmul.mubr.msk.f32.gmra.mrb[104].mxu1 %vm1350_vm2, %v5756_v5 }
 0x183   : > { %2029 = vmatprep.mubr.f32.mxu0 %v5374_v0  ;;  %2166 = vmatprep.mubr.f32.mxu1 %v5374_v0 }
 0x186   : > { %4956 = vmatmul.mubr.msk.f32.gmra.mrb[106].mxu0 %vm1350_vm2, %v5769_v18  ;;  %4968 = vmatmul.mubr.msk.f32.gmra.mrb[106].mxu1 %vm1350_vm2, %v5769_v18 }
 0x187   : > { %2035 = vmatprep.mubr.f32.mxu0 %v5374_v0  ;;  %2172 = vmatprep.mubr.f32.mxu1 %v5374_v0 }
 0x18a   : > { %4957 = vmatmul.mubr.msk.f32.gmra.mrb[108].mxu0 %vm1350_vm2, %v5780_v28  ;;  %4969 = vmatmul.mubr.msk.f32.gmra.mrb[108].mxu1 %vm1350_vm2, %v5780_v28 }
 0x18b   : > { %2041 = vmatprep.mubr.f32.mxu0 %v5374_v0  ;;  %2178 = vmatprep.mubr.f32.mxu1 %v5374_v0 }
 0x18e   : > { %4958 = vmatmul.mubr.msk.f32.gmra.mrb[110].mxu0 %vm1350_vm2, %v5791_v42  ;;  %4970 = vmatmul.mubr.msk.f32.gmra.mrb[110].mxu1 %vm1350_vm2, %v5791_v42 }
 0x18f   : > { %2047 = vmatprep.mubr.f32.mxu0 %v5374_v0  ;;  %2184 = vmatprep.mubr.f32.mxu1 %v5374_v0 }
 0x192   : > { %4959 = vmatmul.mubr.msk.f32.gmra.mrb[112].mxu0 %vm1350_vm2, %v5806_v52  ;;  %4971 = vmatmul.mubr.msk.f32.gmra.mrb[112].mxu1 %vm1350_vm2, %v5806_v52 }
 0x193   : > { %2053 = vmatprep.mubr.f32.mxu0 %v5374_v0  ;;  %2190 = vmatprep.mubr.f32.mxu1 %v5374_v0 }
 0x196   : > { %4960 = vmatmul.mubr.msk.f32.gmra.mrb[114].mxu0 %vm1350_vm2, %v5817_v3  ;;  %4972 = vmatmul.mubr.msk.f32.gmra.mrb[114].mxu1 %vm1350_vm2, %v5817_v3 }
 0x197   : > { %2059 = vmatprep.mubr.f32.mxu0 %v5374_v0  ;;  %2196 = vmatprep.mubr.f32.mxu1 %v5374_v0 }
 0x19a   : > { %4961 = vmatmul.mubr.msk.f32.gmra.mrb[116].mxu0 %vm1350_vm2, %v5836_v13  ;;  %4973 = vmatmul.mubr.msk.f32.gmra.mrb[116].mxu1 %vm1350_vm2, %v5836_v13 }
 0x19b   : > { %2065 = vmatprep.mubr.f32.mxu0 %v5374_v0  ;;  %2202 = vmatprep.mubr.f32.mxu1 %v5374_v0 }
 0x19e   : > { %4962 = vmatmul.mubr.msk.f32.gmra.mrb[118].mxu0 %vm1350_vm2, %v5847_v29  ;;  %4974 = vmatmul.mubr.msk.f32.gmra.mrb[118].mxu1 %vm1350_vm2, %v5847_v29 }
 0x19f   : > { %2273 = vmatprep.mubr.f32.mxu0 %v5374_v0  ;;  %2410 = vmatprep.mubr.f32.mxu1 %v5374_v0 }
 0x1a2   : > { %4975 = vmatmul.mubr.msk.f32.vlgmr.msra.gmra.mrb[120].mxu0 %vm1350_vm2, %v5714_v26  ;;  %4987 = vmatmul.mubr.msk.f32.vlgmr.msra.gmra.mrb[120].mxu1 %vm1350_vm2, %v5714_v26 }
 0x1a3   : > { %2279 = vmatprep.mubr.f32.mxu0 %v5374_v0  ;;  %2416 = vmatprep.mubr.f32.mxu1 %v5374_v0 }
 0x1a6   : > { %4976 = vmatmul.mubr.msk.f32.gmra.mrb[122].mxu0 %vm1350_vm2, %v5725_v39  ;;  %4988 = vmatmul.mubr.msk.f32.gmra.mrb[122].mxu1 %vm1350_vm2, %v5725_v39 }
 0x1a7   : > { %2285 = vmatprep.mubr.f32.mxu0 %v5374_v0  ;;  %2422 = vmatprep.mubr.f32.mxu1 %v5374_v0 }
 0x1aa   : > { %4977 = vmatmul.mubr.msk.f32.gmra.mrb[124].mxu0 %vm1350_vm2, %v5734_v48  ;;  %4989 = vmatmul.mubr.msk.f32.gmra.mrb[124].mxu1 %vm1350_vm2, %v5734_v48 }
 0x1ab   : > { %2291 = vmatprep.mubr.f32.mxu0 %v5374_v0  ;;  %2428 = vmatprep.mubr.f32.mxu1 %v5374_v0 }
 0x1ae   : > { %4978 = vmatmul.mubr.msk.f32.gmra.mrb[126].mxu0 %vm1350_vm2, %v5747_v61  ;;  %4990 = vmatmul.mubr.msk.f32.gmra.mrb[126].mxu1 %vm1350_vm2, %v5747_v61 }
 0x1af   : > { %2297 = vmatprep.mubr.f32.mxu0 %v5374_v0  ;;  %2434 = vmatprep.mubr.f32.mxu1 %v5374_v0 }
 0x1b2   : > { %4979 = vmatmul.mubr.msk.f32.gmra.mrb[128].mxu0 %vm1350_vm2, %v5756_v5  ;;  %4991 = vmatmul.mubr.msk.f32.gmra.mrb[128].mxu1 %vm1350_vm2, %v5756_v5 }
 0x1b3   : > { %2303 = vmatprep.mubr.f32.mxu0 %v5374_v0  ;;  %2440 = vmatprep.mubr.f32.mxu1 %v5374_v0 }
 0x1b6   : > { %4980 = vmatmul.mubr.msk.f32.gmra.mrb[130].mxu0 %vm1350_vm2, %v5769_v18  ;;  %4992 = vmatmul.mubr.msk.f32.gmra.mrb[130].mxu1 %vm1350_vm2, %v5769_v18 }
 0x1b7   : > { %2309 = vmatprep.mubr.f32.mxu0 %v5374_v0  ;;  %2446 = vmatprep.mubr.f32.mxu1 %v5374_v0 }
 0x1ba   : > { %4981 = vmatmul.mubr.msk.f32.gmra.mrb[132].mxu0 %vm1350_vm2, %v5780_v28  ;;  %4993 = vmatmul.mubr.msk.f32.gmra.mrb[132].mxu1 %vm1350_vm2, %v5780_v28 }
 0x1bb   : > { %2315 = vmatprep.mubr.f32.mxu0 %v5374_v0  ;;  %2452 = vmatprep.mubr.f32.mxu1 %v5374_v0 }
 0x1be   : > { %4982 = vmatmul.mubr.msk.f32.gmra.mrb[134].mxu0 %vm1350_vm2, %v5791_v42  ;;  %4994 = vmatmul.mubr.msk.f32.gmra.mrb[134].mxu1 %vm1350_vm2, %v5791_v42 }
 0x1bf   : > { %2321 = vmatprep.mubr.f32.mxu0 %v5374_v0  ;;  %2458 = vmatprep.mubr.f32.mxu1 %v5374_v0 }
 0x1c2   : > { %4983 = vmatmul.mubr.msk.f32.gmra.mrb[136].mxu0 %vm1350_vm2, %v5806_v52  ;;  %4995 = vmatmul.mubr.msk.f32.gmra.mrb[136].mxu1 %vm1350_vm2, %v5806_v52 }
 0x1c3   : > { %2327 = vmatprep.mubr.f32.mxu0 %v5374_v0  ;;  %2464 = vmatprep.mubr.f32.mxu1 %v5374_v0 }
 0x1c6   : > { %4984 = vmatmul.mubr.msk.f32.gmra.mrb[138].mxu0 %vm1350_vm2, %v5817_v3  ;;  %4996 = vmatmul.mubr.msk.f32.gmra.mrb[138].mxu1 %vm1350_vm2, %v5817_v3 }
 0x1c7   : > { %2333 = vmatprep.mubr.f32.mxu0 %v5374_v0  ;;  %2470 = vmatprep.mubr.f32.mxu1 %v5374_v0 }
 0x1ca   : > { %4985 = vmatmul.mubr.msk.f32.gmra.mrb[140].mxu0 %vm1350_vm2, %v5836_v13  ;;  %4997 = vmatmul.mubr.msk.f32.gmra.mrb[140].mxu1 %vm1350_vm2, %v5836_v13 }
 0x1cb   : > { %2339 = vmatprep.mubr.f32.mxu0 %v5374_v0  ;;  %2476 = vmatprep.mubr.f32.mxu1 %v5374_v0 }
 0x1ce   : > { %4986 = vmatmul.mubr.msk.f32.gmra.mrb[142].mxu0 %vm1350_vm2, %v5847_v29  ;;  %4998 = vmatmul.mubr.msk.f32.gmra.mrb[142].mxu1 %vm1350_vm2, %v5847_v29 }
 0x1cf   : > { %2680 = vmatprep.mubr.f32.mxu0 %v5374_v0  ;;  %2751 = vmatprep.mubr.f32.mxu1 %v5374_v0 }
 0x1e5   : > { %v1453_v26 = vpop.f32.mrb[48].mxu0  ;;  %v1590_v39 = vpop.f32.mrb[48].mxu1 }
 0x1e6   : > { %v1455_v48 = vpop.f32.mrb[49].mxu0  ;;  %v1592_v61 = vpop.f32.mrb[49].mxu1 }
 0x1e9   : > { %v1459_v5 = vpop.f32.mrb[50].mxu0  ;;  %v1596_v18 = vpop.f32.mrb[50].mxu1 }
 0x1ea   : > { %v1461_v28 = vpop.f32.mrb[51].mxu0  ;;  %v1598_v42 = vpop.f32.mrb[51].mxu1 }
 0x1ed   : > { %v1465_v52 = vpop.f32.mrb[52].mxu0  ;;  %v1602_v3 = vpop.f32.mrb[52].mxu1 }
 0x1ee   : > { %v1467_v13 = vpop.f32.mrb[53].mxu0  ;;  %v1604_v47 = vpop.f32.mrb[53].mxu1 }
 0x1f1   : > { %v1471_v49 = vpop.f32.mrb[54].mxu0  ;;  %v1608_v50 = vpop.f32.mrb[54].mxu1 }
 0x1f2   : > { %v1473_v51 = vpop.f32.mrb[55].mxu0  ;;  %v1610_v29 = vpop.f32.mrb[55].mxu1 }
 0x1f5   : > { %v1477_v53 = vpop.f32.mrb[56].mxu0  ;;  %v1614_v54 = vpop.f32.mrb[56].mxu1 }
 0x1f6   : > { %v2483_v55 = vmul.f32 %v1477_v53, %v1453_v26  ;;  %v2485_v56 = vmul.f32 %v1614_v54, %v1590_v39  ;;  %v1479_v57 = vpop.f32.mrb[57].mxu0  ;;  %v1616_v58 = vpop.f32.mrb[57].mxu1 }
 0x1f7   : > { %v2484_v59 = vmul.f32 %v1479_v57, %v1455_v48  ;;  %v2486_v60 = vmul.f32 %v1616_v58, %v1592_v61 }
 0x1f9   : > { %v1483_v62 = vpop.f32.mrb[58].mxu0  ;;  %v1620_v63 = vpop.f32.mrb[58].mxu1 }
 0x1fa   : > { %v2499_v43 = vmul.f32 %v1483_v62, %v1459_v5  ;;  %v2501_v44 = vmul.f32 %v1620_v63, %v1596_v18  ;;  %v1485_v1 = vpop.f32.mrb[59].mxu0  ;;  %v1622_v2 = vpop.f32.mrb[59].mxu1 }
 0x1fb   : > { %v2500_v7 = vmul.f32 %v1485_v1, %v1461_v28  ;;  %v2502_v8 = vmul.f32 %v1622_v2, %v1598_v42  ;;  %v6104_v2 = vld [vmem:[%s6298_s4] sm:$0xf] }
 0x1fd   : > { %v1489_v9 = vpop.f32.mrb[60].mxu0  ;;  %v1626_v10 = vpop.f32.mrb[60].mxu1 }
 0x1fe   : > { %v2515_v11 = vmul.f32 %v1489_v9, %v1465_v52  ;;  %v2517_v12 = vmul.f32 %v1626_v10, %v1602_v3  ;;  %v1491_v14 = vpop.f32.mrb[61].mxu0  ;;  %v1628_v15 = vpop.f32.mrb[61].mxu1 }
 0x1ff   : > { %v2516_v4 = vmul.f32 %v1491_v14, %v1467_v13  ;;  %v2518_v6 = vmul.f32 %v1628_v15, %v1604_v47 }
 0x201   : > { %v1495_v16 = vpop.f32.mrb[62].mxu0  ;;  %v1632_v17 = vpop.f32.mrb[62].mxu1 }
 0x202   : > { %v2531_v19 = vmul.f32 %v1495_v16, %v1471_v49  ;;  %v2533_v20 = vmul.f32 %v1632_v17, %v1608_v50  ;;  %v1497_v21 = vpop.f32.mrb[63].mxu0  ;;  %v1634_v22 = vpop.f32.mrb[63].mxu1 }
 0x203   : > { %v2532_v23 = vmul.f32 %v1497_v21, %v1473_v51  ;;  %v2534_v24 = vmul.f32 %v1634_v22, %v1610_v29 }
 0x205   : > { %v1501_v25 = vpop.f32.mrb[64].mxu0  ;;  %v1638_v27 = vpop.f32.mrb[64].mxu1 }
 0x206   : > { %v2547_v30 = vmul.f32 %v2483_v55, %v1501_v25  ;;  %v2549_v31 = vmul.f32 %v2485_v56, %v1638_v27  ;;  %v1503_v32 = vpop.f32.mrb[65].mxu0  ;;  %v1640_v33 = vpop.f32.mrb[65].mxu1 }
 0x207   : > { %v2548_v34 = vmul.f32 %v2484_v59, %v1503_v32  ;;  %v2550_v35 = vmul.f32 %v2486_v60, %v1640_v33 }
 0x209   : > { %v1507_v36 = vpop.f32.mrb[66].mxu0  ;;  %v1644_v37 = vpop.f32.mrb[66].mxu1 }
 0x20a   : > { %v2563_v38 = vmul.f32 %v2499_v43, %v1507_v36  ;;  %v2565_v40 = vmul.f32 %v2501_v44, %v1644_v37  ;;  %v1509_v41 = vpop.f32.mrb[67].mxu0  ;;  %v1646_v45 = vpop.f32.mrb[67].mxu1 }
 0x20b   : > { %v2564_v46 = vmul.f32 %v2500_v7, %v1509_v41  ;;  %v2566_v26 = vmul.f32 %v2502_v8, %v1646_v45 }
 0x20c   : > { %v5143_v39 = vpack.c.bf16 %v2563_v38, %v2547_v30  ;;  %v5151_v48 = vpack.c.bf16 %v2565_v40, %v2549_v31 }
 0x20d   : > { %v5141_v61 = vpack.c.bf16 %v2564_v46, %v2548_v34  ;;  %v5149_v5 = vpack.c.bf16 %v2566_v26, %v2550_v35  ;;  %v1513_v18 = vpop.f32.mrb[68].mxu0  ;;  %v1650_v28 = vpop.f32.mrb[68].mxu1 }
 0x20e   : > { %v2579_v42 = vmul.f32 %v2515_v11, %v1513_v18  ;;  %v2581_v52 = vmul.f32 %v2517_v12, %v1650_v28  ;;  %v1515_v3 = vpop.f32.mrb[69].mxu0  ;;  %v1652_v13 = vpop.f32.mrb[69].mxu1 }
 0x20f   : > { %v2580_v47 = vmul.f32 %v2516_v4, %v1515_v3  ;;  %v2582_v49 = vmul.f32 %v2518_v6, %v1652_v13  ;;  %5142 = vmatprep.subr.bf16.mxu0 %v5141_v61  ;;  %5150 = vmatprep.subr.bf16.mxu1 %v5149_v5 }
 0x210   : > { %5144 = vmatpush1.bf16.msra.mxu0 %v5143_v39  ;;  %5152 = vmatpush1.bf16.msra.mxu1 %v5151_v48 }
 0x211   : > { %v1519_v50 = vpop.f32.mrb[70].mxu0  ;;  %v1656_v51 = vpop.f32.mrb[70].mxu1 }
 0x212   : > { %v2595_v29 = vmul.f32 %v2531_v19, %v1519_v50  ;;  %v2597_v53 = vmul.f32 %v2533_v20, %v1656_v51  ;;  %v1521_v54 = vpop.f32.mrb[71].mxu0  ;;  %v1658_v55 = vpop.f32.mrb[71].mxu1 }
 0x213   : > { %v2596_v56 = vmul.f32 %v2532_v23, %v1521_v54  ;;  %v2598_v57 = vmul.f32 %v2534_v24, %v1658_v55 }
 0x214   : > { %v5147_v58 = vpack.c.bf16 %v2595_v29, %v2579_v42  ;;  %v5155_v59 = vpack.c.bf16 %v2597_v53, %v2581_v52 }
 0x215   : > { %v5145_v60 = vpack.c.bf16 %v2596_v56, %v2580_v47  ;;  %v5153_v62 = vpack.c.bf16 %v2598_v57, %v2582_v49  ;;  %v1727_v63 = vpop.f32.mrb[72].mxu0  ;;  %v1864_v43 = vpop.f32.mrb[72].mxu1 }
 0x216   : > { %v1729_v44 = vpop.f32.mrb[73].mxu0  ;;  %v1866_v1 = vpop.f32.mrb[73].mxu1 }
 0x217   : > { %5146 = vmatprep.subr.bf16.mxu0 %v5145_v60  ;;  %5154 = vmatprep.subr.bf16.mxu1 %v5153_v62 }
 0x218   : > { %5148 = vmatpush1.bf16.msra.mxu0 %v5147_v58  ;;  %5156 = vmatpush1.bf16.msra.mxu1 %v5155_v59 }
 0x219   : > { %v1733_v7 = vpop.f32.mrb[74].mxu0  ;;  %v1870_v8 = vpop.f32.mrb[74].mxu1 }
 0x21a   : > { %v1735_v9 = vpop.f32.mrb[75].mxu0  ;;  %v1872_v10 = vpop.f32.mrb[75].mxu1 }
 0x21b   : > { %4999 = vmatmul.mubr.msk.f32.vlgmr.msra.gmra.mrb[144].mxu0 %vm2612_vm3, %v6104_v2  ;;  %5000 = vmatmul.mubr.msk.f32.vlgmr.msra.gmra.mrb[144].mxu1 %vm2612_vm3, %v6104_v2 }
 0x21c   : > { %2822 = vmatprep.mubr.f32.mxu0 %v5374_v0  ;;  %2893 = vmatprep.mubr.f32.mxu1 %v5374_v0 }
 0x21d   : > { %v1739_v11 = vpop.f32.mrb[76].mxu0  ;;  %v1876_v12 = vpop.f32.mrb[76].mxu1 }
 0x21e   : > { %v1741_v14 = vpop.f32.mrb[77].mxu0  ;;  %v1878_v15 = vpop.f32.mrb[77].mxu1 }
 0x221   : > { %v1745_v4 = vpop.f32.mrb[78].mxu0  ;;  %v1882_v6 = vpop.f32.mrb[78].mxu1 }
 0x222   : > { %v1747_v16 = vpop.f32.mrb[79].mxu0  ;;  %v1884_v17 = vpop.f32.mrb[79].mxu1 }
 0x225   : > { %v1751_v19 = vpop.f32.mrb[80].mxu0  ;;  %v1888_v20 = vpop.f32.mrb[80].mxu1 }
 0x226   : > { %v2487_v21 = vmul.f32 %v1751_v19, %v1727_v63  ;;  %v2489_v22 = vmul.f32 %v1888_v20, %v1864_v43  ;;  %v1753_v23 = vpop.f32.mrb[81].mxu0  ;;  %v1890_v24 = vpop.f32.mrb[81].mxu1 }
 0x227   : > { %v2488_v25 = vmul.f32 %v1753_v23, %v1729_v44  ;;  %v2490_v27 = vmul.f32 %v1890_v24, %v1866_v1 }
 0x229   : > { %v1757_v30 = vpop.f32.mrb[82].mxu0  ;;  %v1894_v31 = vpop.f32.mrb[82].mxu1 }
 0x22a   : > { %v2503_v32 = vmul.f32 %v1757_v30, %v1733_v7  ;;  %v2505_v33 = vmul.f32 %v1894_v31, %v1870_v8  ;;  %v1759_v34 = vpop.f32.mrb[83].mxu0  ;;  %v1896_v35 = vpop.f32.mrb[83].mxu1 }
 0x22b   : > { %v2504_v36 = vmul.f32 %v1759_v34, %v1735_v9  ;;  %v2506_v37 = vmul.f32 %v1896_v35, %v1872_v10 }
 0x22d   : > { %v1763_v38 = vpop.f32.mrb[84].mxu0  ;;  %v1900_v40 = vpop.f32.mrb[84].mxu1 }
 0x22e   : > { %v2519_v41 = vmul.f32 %v1763_v38, %v1739_v11  ;;  %v2521_v45 = vmul.f32 %v1900_v40, %v1876_v12  ;;  %v1765_v46 = vpop.f32.mrb[85].mxu0  ;;  %v1902_v26 = vpop.f32.mrb[85].mxu1 }
 0x22f   : > { %v2520_v39 = vmul.f32 %v1765_v46, %v1741_v14  ;;  %v2522_v48 = vmul.f32 %v1902_v26, %v1878_v15 }
 0x231   : > { %v1769_v61 = vpop.f32.mrb[86].mxu0  ;;  %v1906_v5 = vpop.f32.mrb[86].mxu1 }
 0x232   : > { %v2535_v18 = vmul.f32 %v1769_v61, %v1745_v4  ;;  %v2537_v28 = vmul.f32 %v1906_v5, %v1882_v6  ;;  %v1771_v42 = vpop.f32.mrb[87].mxu0  ;;  %v1908_v52 = vpop.f32.mrb[87].mxu1 }
 0x233   : > { %v2536_v3 = vmul.f32 %v1771_v42, %v1747_v16  ;;  %v2538_v13 = vmul.f32 %v1908_v52, %v1884_v17 }
 0x235   : > { %v1775_v47 = vpop.f32.mrb[88].mxu0  ;;  %v1912_v49 = vpop.f32.mrb[88].mxu1 }
 0x236   : > { %v2551_v50 = vmul.f32 %v2487_v21, %v1775_v47  ;;  %v2553_v51 = vmul.f32 %v2489_v22, %v1912_v49  ;;  %v1777_v29 = vpop.f32.mrb[89].mxu0  ;;  %v1914_v53 = vpop.f32.mrb[89].mxu1 }
 0x237   : > { %v2552_v54 = vmul.f32 %v2488_v25, %v1777_v29  ;;  %v2554_v55 = vmul.f32 %v2490_v27, %v1914_v53 }
 0x239   : > { %v1781_v56 = vpop.f32.mrb[90].mxu0  ;;  %v1918_v57 = vpop.f32.mrb[90].mxu1 }
 0x23a   : > { %v2567_v58 = vmul.f32 %v2503_v32, %v1781_v56  ;;  %v2569_v59 = vmul.f32 %v2505_v33, %v1918_v57  ;;  %v1783_v60 = vpop.f32.mrb[91].mxu0  ;;  %v1920_v62 = vpop.f32.mrb[91].mxu1 }
 0x23b   : > { %v2568_v63 = vmul.f32 %v2504_v36, %v1783_v60  ;;  %v2570_v43 = vmul.f32 %v2506_v37, %v1920_v62 }
 0x23c   : > { %v5159_v44 = vpack.c.bf16 %v2567_v58, %v2551_v50  ;;  %v5167_v1 = vpack.c.bf16 %v2569_v59, %v2553_v51 }
 0x23d   : > { %v5157_v7 = vpack.c.bf16 %v2568_v63, %v2552_v54  ;;  %v5165_v8 = vpack.c.bf16 %v2570_v43, %v2554_v55  ;;  %v1787_v9 = vpop.f32.mrb[92].mxu0  ;;  %v1924_v10 = vpop.f32.mrb[92].mxu1 }
 0x23e   : > { %v2583_v11 = vmul.f32 %v2519_v41, %v1787_v9  ;;  %v2585_v12 = vmul.f32 %v2521_v45, %v1924_v10  ;;  %v1789_v14 = vpop.f32.mrb[93].mxu0  ;;  %v1926_v15 = vpop.f32.mrb[93].mxu1 }
 0x23f   : > { %v2584_v4 = vmul.f32 %v2520_v39, %v1789_v14  ;;  %v2586_v6 = vmul.f32 %v2522_v48, %v1926_v15  ;;  %5158 = vmatprep.subr.bf16.mxu0 %v5157_v7  ;;  %5166 = vmatprep.subr.bf16.mxu1 %v5165_v8 }
 0x240   : > { %5160 = vmatpush1.bf16.msra.mxu0 %v5159_v44  ;;  %5168 = vmatpush1.bf16.msra.mxu1 %v5167_v1 }
 0x241   : > { %v1793_v16 = vpop.f32.mrb[94].mxu0  ;;  %v1930_v17 = vpop.f32.mrb[94].mxu1 }
 0x242   : > { %v2599_v19 = vmul.f32 %v2535_v18, %v1793_v16  ;;  %v2601_v20 = vmul.f32 %v2537_v28, %v1930_v17  ;;  %v1795_v21 = vpop.f32.mrb[95].mxu0  ;;  %v1932_v22 = vpop.f32.mrb[95].mxu1 }
 0x243   : > { %v2600_v23 = vmul.f32 %v2536_v3, %v1795_v21  ;;  %v2602_v24 = vmul.f32 %v2538_v13, %v1932_v22 }
 0x244   : > { %v5163_v25 = vpack.c.bf16 %v2599_v19, %v2583_v11  ;;  %v5171_v27 = vpack.c.bf16 %v2601_v20, %v2585_v12 }
 0x245   : > { %v5161_v30 = vpack.c.bf16 %v2600_v23, %v2584_v4  ;;  %v5169_v31 = vpack.c.bf16 %v2602_v24, %v2586_v6  ;;  %v2001_v32 = vpop.f32.mrb[96].mxu0  ;;  %v2138_v33 = vpop.f32.mrb[96].mxu1 }
 0x246   : > { %v2003_v34 = vpop.f32.mrb[97].mxu0  ;;  %v2140_v35 = vpop.f32.mrb[97].mxu1 }
 0x247   : > { %5162 = vmatprep.subr.bf16.mxu0 %v5161_v30  ;;  %5170 = vmatprep.subr.bf16.mxu1 %v5169_v31 }
 0x248   : > { %5164 = vmatpush1.bf16.msra.mxu0 %v5163_v25  ;;  %5172 = vmatpush1.bf16.msra.mxu1 %v5171_v27 }
 0x249   : > { %v2007_v36 = vpop.f32.mrb[98].mxu0  ;;  %v2144_v37 = vpop.f32.mrb[98].mxu1 }
 0x24a   : > { %v2009_v38 = vpop.f32.mrb[99].mxu0  ;;  %v2146_v40 = vpop.f32.mrb[99].mxu1 }
 0x24b   : > { %5001 = vmatmul.mubr.msk.f32.vlgmr.msra.gmra.mrb[146].mxu0 %vm2612_vm3, %v6104_v2  ;;  %5002 = vmatmul.mubr.msk.f32.vlgmr.msra.gmra.mrb[146].mxu1 %vm2612_vm3, %v6104_v2 }
 0x24c   : > { %2964 = vmatprep.mubr.f32.mxu0 %v5374_v0  ;;  %3035 = vmatprep.mubr.f32.mxu1 %v5374_v0 }
 0x24d   : > { %v2013_v41 = vpop.f32.mrb[100].mxu0  ;;  %v2150_v45 = vpop.f32.mrb[100].mxu1 }
 0x24e   : > { %v2015_v46 = vpop.f32.mrb[101].mxu0  ;;  %v2152_v26 = vpop.f32.mrb[101].mxu1 }
 0x251   : > { %v2019_v39 = vpop.f32.mrb[102].mxu0  ;;  %v2156_v48 = vpop.f32.mrb[102].mxu1 }
 0x252   : > { %v2021_v61 = vpop.f32.mrb[103].mxu0  ;;  %v2158_v5 = vpop.f32.mrb[103].mxu1 }
 0x255   : > { %v2025_v18 = vpop.f32.mrb[104].mxu0  ;;  %v2162_v28 = vpop.f32.mrb[104].mxu1 }
 0x256   : > { %v2491_v42 = vmul.f32 %v2025_v18, %v2001_v32  ;;  %v2493_v52 = vmul.f32 %v2162_v28, %v2138_v33  ;;  %v2027_v3 = vpop.f32.mrb[105].mxu0  ;;  %v2164_v13 = vpop.f32.mrb[105].mxu1 }
 0x257   : > { %v2492_v47 = vmul.f32 %v2027_v3, %v2003_v34  ;;  %v2494_v49 = vmul.f32 %v2164_v13, %v2140_v35 }
 0x259   : > { %v2031_v50 = vpop.f32.mrb[106].mxu0  ;;  %v2168_v51 = vpop.f32.mrb[106].mxu1 }
 0x25a   : > { %v2507_v29 = vmul.f32 %v2031_v50, %v2007_v36  ;;  %v2509_v53 = vmul.f32 %v2168_v51, %v2144_v37  ;;  %v2033_v54 = vpop.f32.mrb[107].mxu0  ;;  %v2170_v55 = vpop.f32.mrb[107].mxu1 }
 0x25b   : > { %v2508_v56 = vmul.f32 %v2033_v54, %v2009_v38  ;;  %v2510_v57 = vmul.f32 %v2170_v55, %v2146_v40 }
 0x25d   : > { %v2037_v58 = vpop.f32.mrb[108].mxu0  ;;  %v2174_v59 = vpop.f32.mrb[108].mxu1 }
 0x25e   : > { %v2523_v60 = vmul.f32 %v2037_v58, %v2013_v41  ;;  %v2525_v62 = vmul.f32 %v2174_v59, %v2150_v45  ;;  %v2039_v63 = vpop.f32.mrb[109].mxu0  ;;  %v2176_v43 = vpop.f32.mrb[109].mxu1 }
 0x25f   : > { %v2524_v44 = vmul.f32 %v2039_v63, %v2015_v46  ;;  %v2526_v1 = vmul.f32 %v2176_v43, %v2152_v26 }
 0x261   : > { %v2043_v7 = vpop.f32.mrb[110].mxu0  ;;  %v2180_v8 = vpop.f32.mrb[110].mxu1 }
 0x262   : > { %v2539_v9 = vmul.f32 %v2043_v7, %v2019_v39  ;;  %v2541_v10 = vmul.f32 %v2180_v8, %v2156_v48  ;;  %v2045_v11 = vpop.f32.mrb[111].mxu0  ;;  %v2182_v12 = vpop.f32.mrb[111].mxu1 }
 0x263   : > { %v2540_v14 = vmul.f32 %v2045_v11, %v2021_v61  ;;  %v2542_v15 = vmul.f32 %v2182_v12, %v2158_v5 }
 0x265   : > { %v2049_v4 = vpop.f32.mrb[112].mxu0  ;;  %v2186_v6 = vpop.f32.mrb[112].mxu1 }
 0x266   : > { %v2555_v16 = vmul.f32 %v2491_v42, %v2049_v4  ;;  %v2557_v17 = vmul.f32 %v2493_v52, %v2186_v6  ;;  %v2051_v19 = vpop.f32.mrb[113].mxu0  ;;  %v2188_v20 = vpop.f32.mrb[113].mxu1 }
 0x267   : > { %v2556_v21 = vmul.f32 %v2492_v47, %v2051_v19  ;;  %v2558_v22 = vmul.f32 %v2494_v49, %v2188_v20 }
 0x269   : > { %v2055_v23 = vpop.f32.mrb[114].mxu0  ;;  %v2192_v24 = vpop.f32.mrb[114].mxu1 }
 0x26a   : > { %v2571_v25 = vmul.f32 %v2507_v29, %v2055_v23  ;;  %v2573_v27 = vmul.f32 %v2509_v53, %v2192_v24  ;;  %v2057_v30 = vpop.f32.mrb[115].mxu0  ;;  %v2194_v31 = vpop.f32.mrb[115].mxu1 }
 0x26b   : > { %v2572_v32 = vmul.f32 %v2508_v56, %v2057_v30  ;;  %v2574_v33 = vmul.f32 %v2510_v57, %v2194_v31 }
 0x26c   : > { %v5175_v34 = vpack.c.bf16 %v2571_v25, %v2555_v16  ;;  %v5183_v35 = vpack.c.bf16 %v2573_v27, %v2557_v17 }
 0x26d   : > { %v5173_v36 = vpack.c.bf16 %v2572_v32, %v2556_v21  ;;  %v5181_v37 = vpack.c.bf16 %v2574_v33, %v2558_v22  ;;  %v2061_v38 = vpop.f32.mrb[116].mxu0  ;;  %v2198_v40 = vpop.f32.mrb[116].mxu1 }
 0x26e   : > { %v2587_v41 = vmul.f32 %v2523_v60, %v2061_v38  ;;  %v2589_v45 = vmul.f32 %v2525_v62, %v2198_v40  ;;  %v2063_v46 = vpop.f32.mrb[117].mxu0  ;;  %v2200_v26 = vpop.f32.mrb[117].mxu1 }
 0x26f   : > { %v2588_v39 = vmul.f32 %v2524_v44, %v2063_v46  ;;  %v2590_v48 = vmul.f32 %v2526_v1, %v2200_v26  ;;  %5174 = vmatprep.subr.bf16.mxu0 %v5173_v36  ;;  %5182 = vmatprep.subr.bf16.mxu1 %v5181_v37 }
 0x270   : > { %5176 = vmatpush1.bf16.msra.mxu0 %v5175_v34  ;;  %5184 = vmatpush1.bf16.msra.mxu1 %v5183_v35 }
 0x271   : > { %v2067_v61 = vpop.f32.mrb[118].mxu0  ;;  %v2204_v5 = vpop.f32.mrb[118].mxu1 }
 0x272   : > { %v2603_v18 = vmul.f32 %v2539_v9, %v2067_v61  ;;  %v2605_v28 = vmul.f32 %v2541_v10, %v2204_v5  ;;  %v2069_v42 = vpop.f32.mrb[119].mxu0  ;;  %v2206_v52 = vpop.f32.mrb[119].mxu1 }
 0x273   : > { %v2604_v3 = vmul.f32 %v2540_v14, %v2069_v42  ;;  %v2606_v13 = vmul.f32 %v2542_v15, %v2206_v52 }
 0x274   : > { %v5179_v47 = vpack.c.bf16 %v2603_v18, %v2587_v41  ;;  %v5187_v49 = vpack.c.bf16 %v2605_v28, %v2589_v45 }
 0x275   : > { %v5177_v50 = vpack.c.bf16 %v2604_v3, %v2588_v39  ;;  %v5185_v51 = vpack.c.bf16 %v2606_v13, %v2590_v48  ;;  %v2275_v29 = vpop.f32.mrb[120].mxu0  ;;  %v2412_v53 = vpop.f32.mrb[120].mxu1 }
 0x276   : > { %v2277_v54 = vpop.f32.mrb[121].mxu0  ;;  %v2414_v55 = vpop.f32.mrb[121].mxu1 }
 0x277   : > { %5178 = vmatprep.subr.bf16.mxu0 %v5177_v50  ;;  %5186 = vmatprep.subr.bf16.mxu1 %v5185_v51 }
 0x278   : > { %5180 = vmatpush1.bf16.msra.mxu0 %v5179_v47  ;;  %5188 = vmatpush1.bf16.msra.mxu1 %v5187_v49 }
 0x279   : > { %v2281_v56 = vpop.f32.mrb[122].mxu0  ;;  %v2418_v57 = vpop.f32.mrb[122].mxu1 }
 0x27a   : > { %v2283_v58 = vpop.f32.mrb[123].mxu0  ;;  %v2420_v59 = vpop.f32.mrb[123].mxu1 }
 0x27b   : > { %5003 = vmatmul.mubr.msk.f32.vlgmr.msra.gmra.mrb[148].mxu0 %vm2612_vm3, %v6104_v2  ;;  %5004 = vmatmul.mubr.msk.f32.vlgmr.msra.gmra.mrb[148].mxu1 %vm2612_vm3, %v6104_v2 }
 0x27c   : > { %3106 = vmatprep.mubr.f32.mxu0 %v5374_v0  ;;  %3177 = vmatprep.mubr.f32.mxu1 %v5374_v0 }
 0x27d   : > { %v2287_v60 = vpop.f32.mrb[124].mxu0  ;;  %v2424_v62 = vpop.f32.mrb[124].mxu1 }
 0x27e   : > { %v2289_v63 = vpop.f32.mrb[125].mxu0  ;;  %v2426_v43 = vpop.f32.mrb[125].mxu1 }
 0x281   : > { %v2293_v44 = vpop.f32.mrb[126].mxu0  ;;  %v2430_v1 = vpop.f32.mrb[126].mxu1 }
 0x282   : > { %v2295_v7 = vpop.f32.mrb[127].mxu0  ;;  %v2432_v8 = vpop.f32.mrb[127].mxu1 }
 0x285   : > { %v2299_v9 = vpop.f32.mrb[128].mxu0  ;;  %v2436_v10 = vpop.f32.mrb[128].mxu1 }
 0x286   : > { %v2495_v11 = vmul.f32 %v2299_v9, %v2275_v29  ;;  %v2497_v12 = vmul.f32 %v2436_v10, %v2412_v53  ;;  %v2301_v14 = vpop.f32.mrb[129].mxu0  ;;  %v2438_v15 = vpop.f32.mrb[129].mxu1 }
 0x287   : > { %v2496_v4 = vmul.f32 %v2301_v14, %v2277_v54  ;;  %v2498_v6 = vmul.f32 %v2438_v15, %v2414_v55 }
 0x289   : > { %v2305_v16 = vpop.f32.mrb[130].mxu0  ;;  %v2442_v17 = vpop.f32.mrb[130].mxu1 }
 0x28a   : > { %v2511_v19 = vmul.f32 %v2305_v16, %v2281_v56  ;;  %v2513_v20 = vmul.f32 %v2442_v17, %v2418_v57  ;;  %v2307_v21 = vpop.f32.mrb[131].mxu0  ;;  %v2444_v22 = vpop.f32.mrb[131].mxu1 }
 0x28b   : > { %v2512_v23 = vmul.f32 %v2307_v21, %v2283_v58  ;;  %v2514_v24 = vmul.f32 %v2444_v22, %v2420_v59 }
 0x28d   : > { %v2311_v25 = vpop.f32.mrb[132].mxu0  ;;  %v2448_v27 = vpop.f32.mrb[132].mxu1 }
 0x28e   : > { %v2527_v30 = vmul.f32 %v2311_v25, %v2287_v60  ;;  %v2529_v31 = vmul.f32 %v2448_v27, %v2424_v62  ;;  %v2313_v32 = vpop.f32.mrb[133].mxu0  ;;  %v2450_v33 = vpop.f32.mrb[133].mxu1 }
 0x28f   : > { %v2528_v34 = vmul.f32 %v2313_v32, %v2289_v63  ;;  %v2530_v35 = vmul.f32 %v2450_v33, %v2426_v43 }
 0x291   : > { %v2317_v36 = vpop.f32.mrb[134].mxu0  ;;  %v2454_v37 = vpop.f32.mrb[134].mxu1 }
 0x292   : > { %v2543_v38 = vmul.f32 %v2317_v36, %v2293_v44  ;;  %v2545_v40 = vmul.f32 %v2454_v37, %v2430_v1  ;;  %v2319_v41 = vpop.f32.mrb[135].mxu0  ;;  %v2456_v45 = vpop.f32.mrb[135].mxu1 }
 0x293   : > { %v2544_v46 = vmul.f32 %v2319_v41, %v2295_v7  ;;  %v2546_v26 = vmul.f32 %v2456_v45, %v2432_v8 }
 0x295   : > { %v2323_v39 = vpop.f32.mrb[136].mxu0  ;;  %v2460_v48 = vpop.f32.mrb[136].mxu1 }
 0x296   : > { %v2559_v61 = vmul.f32 %v2495_v11, %v2323_v39  ;;  %v2561_v5 = vmul.f32 %v2497_v12, %v2460_v48  ;;  %v2325_v18 = vpop.f32.mrb[137].mxu0  ;;  %v2462_v28 = vpop.f32.mrb[137].mxu1 }
 0x297   : > { %v2560_v42 = vmul.f32 %v2496_v4, %v2325_v18  ;;  %v2562_v52 = vmul.f32 %v2498_v6, %v2462_v28 }
 0x299   : > { %v2329_v3 = vpop.f32.mrb[138].mxu0  ;;  %v2466_v13 = vpop.f32.mrb[138].mxu1 }
 0x29a   : > { %v2575_v47 = vmul.f32 %v2511_v19, %v2329_v3  ;;  %v2577_v49 = vmul.f32 %v2513_v20, %v2466_v13  ;;  %v2331_v50 = vpop.f32.mrb[139].mxu0  ;;  %v2468_v51 = vpop.f32.mrb[139].mxu1 }
 0x29b   : > { %v2576_v29 = vmul.f32 %v2512_v23, %v2331_v50  ;;  %v2578_v53 = vmul.f32 %v2514_v24, %v2468_v51 }
 0x29c   : > { %v5191_v54 = vpack.c.bf16 %v2575_v47, %v2559_v61  ;;  %v5199_v55 = vpack.c.bf16 %v2577_v49, %v2561_v5 }
 0x29d   : > { %v5189_v56 = vpack.c.bf16 %v2576_v29, %v2560_v42  ;;  %v5197_v57 = vpack.c.bf16 %v2578_v53, %v2562_v52  ;;  %v2335_v58 = vpop.f32.mrb[140].mxu0  ;;  %v2472_v59 = vpop.f32.mrb[140].mxu1 }
 0x29e   : > { %v2591_v60 = vmul.f32 %v2527_v30, %v2335_v58  ;;  %v2593_v62 = vmul.f32 %v2529_v31, %v2472_v59  ;;  %v2337_v63 = vpop.f32.mrb[141].mxu0  ;;  %v2474_v43 = vpop.f32.mrb[141].mxu1  ;;  %v3200_v30 = vld [vmem:[%s6299_s5] sm:$0xff] }
 0x29f   : > { %v2592_v44 = vmul.f32 %v2528_v34, %v2337_v63  ;;  %v2594_v1 = vmul.f32 %v2530_v35, %v2474_v43  ;;  %5190 = vmatprep.subr.bf16.mxu0 %v5189_v56  ;;  %5198 = vmatprep.subr.bf16.mxu1 %v5197_v57  ;;  %v3838_v56 = vld [vmem:[%s6300_s6] sm:$0xf] }
 0x2a0   : > { %5192 = vmatpush1.bf16.msra.mxu0 %v5191_v54  ;;  %5200 = vmatpush1.bf16.msra.mxu1 %v5199_v55 }
 0x2a1   : > { %v2341_v7 = vpop.f32.mrb[142].mxu0  ;;  %v2478_v8 = vpop.f32.mrb[142].mxu1 }
 0x2a2   : > { %v2607_v9 = vmul.f32 %v2543_v38, %v2341_v7  ;;  %v2609_v10 = vmul.f32 %v2545_v40, %v2478_v8  ;;  %v2343_v11 = vpop.f32.mrb[143].mxu0  ;;  %v2480_v12 = vpop.f32.mrb[143].mxu1 }
 0x2a3   : > { %v2608_v14 = vmul.f32 %v2544_v46, %v2343_v11  ;;  %v2610_v15 = vmul.f32 %v2546_v26, %v2480_v12 }
 0x2a4   : > { %v5195_v4 = vpack.c.bf16 %v2607_v9, %v2591_v60  ;;  %v5203_v6 = vpack.c.bf16 %v2609_v10, %v2593_v62 }
 0x2a5   : > { %v5193_v16 = vpack.c.bf16 %v2608_v14, %v2592_v44  ;;  %v5201_v17 = vpack.c.bf16 %v2610_v15, %v2594_v1 }
 0x2a7   : > { %5194 = vmatprep.subr.bf16.mxu0 %v5193_v16  ;;  %5202 = vmatprep.subr.bf16.mxu1 %v5201_v17 }
 0x2a8   : > { %5196 = vmatpush1.bf16.msra.mxu0 %v5195_v4  ;;  %5204 = vmatpush1.bf16.msra.mxu1 %v5203_v6 }
 0x2ab   : > { %5005 = vmatmul.mubr.msk.f32.vlgmr.msra.gmra.mrb[150].mxu0 %vm2612_vm3, %v6104_v2  ;;  %5006 = vmatmul.mubr.msk.f32.vlgmr.msra.gmra.mrb[150].mxu1 %vm2612_vm3, %v6104_v2 }
 0x2ac   : > { %3318 = vmatprep.mubr.f32.mxu0 %v5374_v0  ;;  %3389 = vmatprep.mubr.f32.mxu1 %v5374_v0 }
 0x2ee   : > { %v2682_v19 = vpop.f32.mrb[144].mxu0  ;;  %v2753_v20 = vpop.f32.mrb[144].mxu1 }
 0x2ef   : > { %v3184_v21 = vmax.f32 %v2682_v19, 0.0  ;;  %v3186_v22 = vmax.f32 %v2753_v20, 0.0  ;;  %v2684_v23 = vpop.f32.mrb[145].mxu0  ;;  %v2755_v24 = vpop.f32.mrb[145].mxu1 }
 0x2f0   : > { %v3185_v25 = vmax.f32 %v2684_v23, 0.0  ;;  %v3187_v27 = vmax.f32 %v2755_v24, 0.0  ;;  %v4411_v24 = vld [vmem:[%s6186_s18] sm:$0xff] }
 0x2f2   : > { %5007 = vmatprep.subr.msk.mxu0 %vm3205_vm4, %v3185_v25  ;;  %5010 = vmatprep.subr.msk.mxu1 %vm3205_vm4, %v3187_v27  ;;  %v4412_v27 = vld [vmem:[%s6186_s18 + $0x8] sm:$0xff] }
 0x2f3   : > { %5008 = vmatpush1.msk.msra.mxu0 %vm3205_vm4, %v3184_v21  ;;  %5011 = vmatpush1.msk.msra.mxu1 %vm3205_vm4, %v3186_v22 }
 0x2f4   : > { %5009 = vmatmul.mubr.msk.f32.vlgmr.msra.gmra.mrb[152].mxu0 %vm3201_vm5, %v3200_v30  ;;  %5012 = vmatmul.mubr.msk.f32.vlgmr.msra.gmra.mrb[152].mxu1 %vm3201_vm5, %v3200_v30 }
 0x2f5   : > { %3460 = vmatprep.mubr.f32.mxu0 %v5374_v0  ;;  %3531 = vmatprep.mubr.f32.mxu1 %v5374_v0 }
 0x31e   : > { %v2824_v2 = vpop.f32.mrb[146].mxu0  ;;  %v2895_v31 = vpop.f32.mrb[146].mxu1 }
 0x31f   : > { %v3188_v32 = vmax.f32 %v2824_v2, 0.0  ;;  %v3190_v33 = vmax.f32 %v2895_v31, 0.0  ;;  %v2826_v34 = vpop.f32.mrb[147].mxu0  ;;  %v2897_v35 = vpop.f32.mrb[147].mxu1 }
 0x320   : > { %v3189_v36 = vmax.f32 %v2826_v34, 0.0  ;;  %v3191_v37 = vmax.f32 %v2897_v35, 0.0 }
 0x322   : > { %5013 = vmatprep.subr.msk.mxu0 %vm3205_vm4, %v3189_v36  ;;  %5016 = vmatprep.subr.msk.mxu1 %vm3205_vm4, %v3191_v37 }
 0x323   : > { %5014 = vmatpush1.msk.msra.mxu0 %vm3205_vm4, %v3188_v32  ;;  %5017 = vmatpush1.msk.msra.mxu1 %vm3205_vm4, %v3190_v33 }
 0x324   : > { %5015 = vmatmul.mubr.msk.f32.vlgmr.msra.gmra.mrb[154].mxu0 %vm3201_vm5, %v3200_v30  ;;  %5018 = vmatmul.mubr.msk.f32.vlgmr.msra.gmra.mrb[154].mxu1 %vm3201_vm5, %v3200_v30 }
 0x325   : > { %3602 = vmatprep.mubr.f32.mxu0 %v5374_v0  ;;  %3673 = vmatprep.mubr.f32.mxu1 %v5374_v0 }
 0x34e   : > { %v2966_v38 = vpop.f32.mrb[148].mxu0  ;;  %v3037_v40 = vpop.f32.mrb[148].mxu1 }
 0x34f   : > { %v3192_v41 = vmax.f32 %v2966_v38, 0.0  ;;  %v3194_v45 = vmax.f32 %v3037_v40, 0.0  ;;  %v2968_v46 = vpop.f32.mrb[149].mxu0  ;;  %v3039_v26 = vpop.f32.mrb[149].mxu1 }
 0x350   : > { %v3193_v39 = vmax.f32 %v2968_v46, 0.0  ;;  %v3195_v48 = vmax.f32 %v3039_v26, 0.0 }
 0x352   : > { %5019 = vmatprep.subr.msk.mxu0 %vm3205_vm4, %v3193_v39  ;;  %5022 = vmatprep.subr.msk.mxu1 %vm3205_vm4, %v3195_v48  ;;  %v5375_v48 = vmov 1966171168  }
 0x353   : > { %5020 = vmatpush1.msk.msra.mxu0 %vm3205_vm4, %v3192_v41  ;;  %5023 = vmatpush1.msk.msra.mxu1 %vm3205_vm4, %v3194_v45 }
 0x354   : > { %5021 = vmatmul.mubr.msk.f32.vlgmr.msra.gmra.mrb[156].mxu0 %vm3201_vm5, %v3200_v30  ;;  %5024 = vmatmul.mubr.msk.f32.vlgmr.msra.gmra.mrb[156].mxu1 %vm3201_vm5, %v3200_v30 }
 0x355   : > { %3744 = vmatprep.mubr.f32.mxu0 %v5374_v0  ;;  %3815 = vmatprep.mubr.f32.mxu1 %v5374_v0 }
 0x37e   : > { %v3108_v61 = vpop.f32.mrb[150].mxu0  ;;  %v3179_v5 = vpop.f32.mrb[150].mxu1 }
 0x37f   : > { %v3110_v18 = vpop.f32.mrb[151].mxu0  ;;  %v3181_v28 = vpop.f32.mrb[151].mxu1  ;;  %v3196_v3 = vmax.f32 %v3108_v61, 0.0  ;;  %v3198_v13 = vmax.f32 %v3179_v5, 0.0  ;;  %v4616_v61 = vunpack.c.l.s4 %v5375_v48  ;;  %v4618_v5 = vlaneseq }
 0x380   : > { %v3197_v42 = vmax.f32 %v3110_v18, 0.0  ;;  %v3199_v52 = vmax.f32 %v3181_v28, 0.0 }
 0x382   : > { %5025 = vmatprep.subr.msk.mxu0 %vm3205_vm4, %v3197_v42  ;;  %5028 = vmatprep.subr.msk.mxu1 %vm3205_vm4, %v3199_v52 }
 0x383   : > { %5026 = vmatpush1.msk.msra.mxu0 %vm3205_vm4, %v3196_v3  ;;  %5029 = vmatpush1.msk.msra.mxu1 %vm3205_vm4, %v3198_v13 }
 0x384   : > { %5027 = vmatmul.mubr.msk.f32.vlgmr.msra.gmra.mrb[158].mxu0 %vm3201_vm5, %v3200_v30  ;;  %5030 = vmatmul.mubr.msk.f32.vlgmr.msra.gmra.mrb[158].mxu1 %vm3201_vm5, %v3200_v30 }
 0x385   : > { %3907 = vmatprep.mubr.f32.mxu0 %v5374_v0  ;;  %3978 = vmatprep.mubr.f32.mxu1 %v5374_v0 }
 0x3c7   : > { %v3320_v47 = vpop.f32.mrb[152].mxu0  ;;  %v3391_v49 = vpop.f32.mrb[152].mxu1 }
 0x3c8   : > { %v3822_v50 = vmax.f32 %v3320_v47, 0.0  ;;  %v3824_v51 = vmax.f32 %v3391_v49, 0.0  ;;  %v3322_v29 = vpop.f32.mrb[153].mxu0  ;;  %v3393_v53 = vpop.f32.mrb[153].mxu1 }
 0x3c9   : > { %v3823_v54 = vmax.f32 %v3322_v29, 0.0  ;;  %v3825_v55 = vmax.f32 %v3393_v53, 0.0 }
 0x3cb   : > { %3843 = vmatprep.subr.mxu0 %v3823_v54  ;;  %3914 = vmatprep.subr.mxu1 %v3825_v55 }
 0x3cc   : > { %3844 = vmatpush1.msra.mxu0 %v3822_v50  ;;  %3915 = vmatpush1.msra.mxu1 %v3824_v51  ;;  %v4617_v50 = vunpack.c.0.s8 %v4616_v61  ;;  %v4619_v51 = vshrl.u32 %v4618_v5, 7 }
 0x3cd   : > { %5031 = vmatmul.mubr.msk.f32.vlgmr.msra.gmra.mrb[160].mxu0 %vm3839_vm6, %v3838_v56  ;;  %5032 = vmatmul.mubr.msk.f32.vlgmr.msra.gmra.mrb[160].mxu1 %vm3839_vm6, %v3838_v56 }
 0x3ce   : > { %4049 = vmatprep.mubr.f32.mxu0 %v5374_v0  ;;  %4120 = vmatprep.mubr.f32.mxu1 %v5374_v0 }
 0x3f7   : > { %v3462_v57 = vpop.f32.mrb[154].mxu0  ;;  %v3533_v58 = vpop.f32.mrb[154].mxu1 }
 0x3f8   : > { %v3826_v59 = vmax.f32 %v3462_v57, 0.0  ;;  %v3828_v60 = vmax.f32 %v3533_v58, 0.0  ;;  %v3464_v62 = vpop.f32.mrb[155].mxu0  ;;  %v3535_v63 = vpop.f32.mrb[155].mxu1 }
 0x3f9   : > { %v3827_v43 = vmax.f32 %v3464_v62, 0.0  ;;  %v3829_v44 = vmax.f32 %v3535_v63, 0.0  ;;  %v6194_v62 = vsub.s32 %v4617_v50, %v4619_v51 }
 0x3fb   : > { %3985 = vmatprep.subr.mxu0 %v3827_v43  ;;  %4056 = vmatprep.subr.mxu1 %v3829_v44 }
 0x3fc   : > { %3986 = vmatpush1.msra.mxu0 %v3826_v59  ;;  %4057 = vmatpush1.msra.mxu1 %v3828_v60 }
 0x3fd   : > { %5033 = vmatmul.mubr.msk.f32.vlgmr.msra.gmra.mrb[162].mxu0 %vm3839_vm6, %v3838_v56  ;;  %5034 = vmatmul.mubr.msk.f32.vlgmr.msra.gmra.mrb[162].mxu1 %vm3839_vm6, %v3838_v56 }
 0x3fe   : > { %4191 = vmatprep.mubr.f32.mxu0 %v5374_v0  ;;  %4262 = vmatprep.mubr.f32.mxu1 %v5374_v0 }
 0x427   : > { %v3604_v1 = vpop.f32.mrb[156].mxu0  ;;  %v3675_v7 = vpop.f32.mrb[156].mxu1 }
 0x428   : > { %v3830_v8 = vmax.f32 %v3604_v1, 0.0  ;;  %v3832_v9 = vmax.f32 %v3675_v7, 0.0  ;;  %v3606_v10 = vpop.f32.mrb[157].mxu0  ;;  %v3677_v11 = vpop.f32.mrb[157].mxu1 }
 0x429   : > { %v3831_v12 = vmax.f32 %v3606_v10, 0.0  ;;  %v3833_v14 = vmax.f32 %v3677_v11, 0.0 }
 0x42b   : > { %4127 = vmatprep.subr.mxu0 %v3831_v12  ;;  %4198 = vmatprep.subr.mxu1 %v3833_v14  ;;  %v4413_v12 = vld [vmem:[%s6186_s18 + $0x10] sm:$0xff] }
 0x42c   : > { %4128 = vmatpush1.msra.mxu0 %v3830_v8  ;;  %4199 = vmatpush1.msra.mxu1 %v3832_v9 }
 0x42d   : > { %5035 = vmatmul.mubr.msk.f32.vlgmr.msra.gmra.mrb[164].mxu0 %vm3839_vm6, %v3838_v56  ;;  %5036 = vmatmul.mubr.msk.f32.vlgmr.msra.gmra.mrb[164].mxu1 %vm3839_vm6, %v3838_v56 }
 0x42e   : > { %4333 = vmatprep.mubr.f32.mxu0 %v5374_v0  ;;  %4404 = vmatprep.mubr.f32.mxu1 %v5374_v0 }
 0x457   : > { %v3746_v15 = vpop.f32.mrb[158].mxu0  ;;  %v3817_v4 = vpop.f32.mrb[158].mxu1 }
 0x458   : > { %v3748_v6 = vpop.f32.mrb[159].mxu0  ;;  %v3819_v16 = vpop.f32.mrb[159].mxu1  ;;  %v3834_v20 = vmax.f32 %v3746_v15, 0.0  ;;  %v3836_v21 = vmax.f32 %v3817_v4, 0.0  ;;  %v4414_v15 = vld [vmem:[%s6186_s18 + $0x18] sm:$0xff] }
 0x459   : > { %v3835_v17 = vmax.f32 %v3748_v6, 0.0  ;;  %v3837_v19 = vmax.f32 %v3819_v16, 0.0 }
 0x45b   : > { %4269 = vmatprep.subr.mxu0 %v3835_v17  ;;  %4340 = vmatprep.subr.mxu1 %v3837_v19 }
 0x45c   : > { %4270 = vmatpush1.msra.mxu0 %v3834_v20  ;;  %4341 = vmatpush1.msra.mxu1 %v3836_v21 }
 0x45d   : > { %5037 = vmatmul.mubr.msk.f32.vlgmr.msra.gmra.mrb[166].mxu0 %vm3839_vm6, %v3838_v56  ;;  %5038 = vmatmul.mubr.msk.f32.vlgmr.msra.gmra.mrb[166].mxu1 %vm3839_vm6, %v3838_v56 }
 0x4a0   : > { %v3909_v0 = vpop.f32.mrb[160].mxu0  ;;  %v3980_v22 = vpop.f32.mrb[160].mxu1 }
 0x4a1   : > { %v3911_v23 = vpop.f32.mrb[161].mxu0  ;;  %v3982_v25 = vpop.f32.mrb[161].mxu1 }
 0x4a2   : > { %v4435_v30 = vcombine.low %v3909_v0, %v3911_v23  ;;  %v4436_v2 = vcombine.low %v3980_v22, %v3982_v25 }
 0x4a4   : > { %v4451_v31 = vmul.f32 %v4435_v30, %v4411_v24  ;;  %v4452_v32 = vmul.f32 %v4436_v2, %v4412_v27 }
 0x4a6   : > { %v4467_v33 = vcombine.high %v4451_v31, %v4451_v31  ;;  %v4483_v34 = vsel %vm3205_vm4, %v4451_v31, 0.0  ;;  %v4468_v35 = vcombine.high %v4452_v32, %v4452_v32  ;;  %v4497_v36 = vsel %vm3205_vm4, %v4452_v32, 0.0 }
 0x4a7   : > { %v4484_v37 = vrot.slane %v4483_v34, 4  ;;  %v4498_v38 = vrot.slane %v4497_v36, 4 }
 0x4a8   : > { %v4490_v40 = vsel %vm3205_vm4, %v4467_v33, 0.0  ;;  %v4504_v41 = vsel %vm3205_vm4, %v4468_v35, 0.0 }
 0x4a9   : > { %v4485_v45 = vadd.f32 %v4484_v37, %v4483_v34  ;;  %v4491_v46 = vrot.slane %v4490_v40, 4  ;;  %v4499_v26 = vadd.f32 %v4498_v38, %v4497_v36  ;;  %v4505_v39 = vrot.slane %v4504_v41, 4 }
 0x4ab   : > { %v4486_v18 = vrot.slane %v4485_v45, 2  ;;  %v4492_v28 = vadd.f32 %v4491_v46, %v4490_v40  ;;  %v4500_v42 = vrot.slane %v4499_v26, 2  ;;  %v4506_v52 = vadd.f32 %v4505_v39, %v4504_v41 }
 0x4ad   : > { %v4487_v3 = vadd.f32 %v4486_v18, %v4485_v45  ;;  %v4493_v13 = vrot.slane %v4492_v28, 2  ;;  %v4501_v47 = vadd.f32 %v4500_v42, %v4499_v26  ;;  %v4507_v49 = vrot.slane %v4506_v52, 2 }
 0x4af   : > { %v4488_v29 = vrot.slane %v4487_v3, 1  ;;  %v4494_v53 = vadd.f32 %v4493_v13, %v4492_v28  ;;  %v4502_v54 = vrot.slane %v4501_v47, 1  ;;  %v4508_v55 = vadd.f32 %v4507_v49, %v4506_v52 }
 0x4b1   : > { %v4489_v56 = vadd.f32 %v4488_v29, %v4487_v3  ;;  %v4495_v57 = vrot.slane %v4494_v53, 1  ;;  %v4503_v58 = vadd.f32 %v4502_v54, %v4501_v47  ;;  %v4509_v59 = vrot.slane %v4508_v55, 1 }
 0x4b3   : > { %v4496_v60 = vadd.f32 %v4495_v57, %v4494_v53  ;;  %v4510_v63 = vadd.f32 %v4509_v59, %v4508_v55  ;;  %v4415_v55 = vld [vmem:[%s6186_s18 + $0x20] sm:$0xff]  ;;  %v4416_v57 = vld [vmem:[%s6186_s18 + $0x28] sm:$0xff] }
 0x4b5   : > { %v4611_v43 = vcombine.low %v4489_v56, %v4496_v60  ;;  %v4612_v44 = vcombine.low %v4503_v58, %v4510_v63 }
 0x4b7   : > { %v4621_v1 = vrot.slane %v4611_v43, %v6194_v62  ;;  %v4628_v7 = vrot.slane %v4612_v44, %v6194_v62 }
 0x4b9   : > { %v4643_v8 = vcombine.low %v4621_v1, %v4628_v7 }
 0x4bb   : > { %v4651_v49 = vrot.slane %v4643_v8, %v6194_v62 }
 0x4d0   : > { %v4051_v9 = vpop.f32.mrb[162].mxu0  ;;  %v4122_v10 = vpop.f32.mrb[162].mxu1 }
 0x4d1   : > { %v4053_v11 = vpop.f32.mrb[163].mxu0  ;;  %v4124_v14 = vpop.f32.mrb[163].mxu1 }
 0x4d2   : > { %v4437_v4 = vcombine.low %v4051_v9, %v4053_v11  ;;  %v4438_v6 = vcombine.low %v4122_v10, %v4124_v14 }
 0x4d4   : > { %v4453_v16 = vmul.f32 %v4437_v4, %v4413_v12  ;;  %v4454_v17 = vmul.f32 %v4438_v6, %v4414_v15 }
 0x4d6   : > { %v4469_v19 = vcombine.high %v4453_v16, %v4453_v16  ;;  %v4511_v20 = vsel %vm3205_vm4, %v4453_v16, 0.0  ;;  %v4470_v21 = vcombine.high %v4454_v17, %v4454_v17  ;;  %v4525_v0 = vsel %vm3205_vm4, %v4454_v17, 0.0 }
 0x4d7   : > { %v4512_v22 = vrot.slane %v4511_v20, 4  ;;  %v4526_v23 = vrot.slane %v4525_v0, 4 }
 0x4d8   : > { %v4518_v24 = vsel %vm3205_vm4, %v4469_v19, 0.0  ;;  %v4532_v25 = vsel %vm3205_vm4, %v4470_v21, 0.0 }
 0x4d9   : > { %v4513_v27 = vadd.f32 %v4512_v22, %v4511_v20  ;;  %v4519_v30 = vrot.slane %v4518_v24, 4  ;;  %v4527_v2 = vadd.f32 %v4526_v23, %v4525_v0  ;;  %v4533_v31 = vrot.slane %v4532_v25, 4 }
 0x4db   : > { %v4514_v32 = vrot.slane %v4513_v27, 2  ;;  %v4520_v33 = vadd.f32 %v4519_v30, %v4518_v24  ;;  %v4528_v34 = vrot.slane %v4527_v2, 2  ;;  %v4534_v35 = vadd.f32 %v4533_v31, %v4532_v25 }
 0x4dd   : > { %v4515_v36 = vadd.f32 %v4514_v32, %v4513_v27  ;;  %v4521_v37 = vrot.slane %v4520_v33, 2  ;;  %v4529_v38 = vadd.f32 %v4528_v34, %v4527_v2  ;;  %v4535_v40 = vrot.slane %v4534_v35, 2 }
 0x4df   : > { %v4516_v41 = vrot.slane %v4515_v36, 1  ;;  %v4522_v45 = vadd.f32 %v4521_v37, %v4520_v33  ;;  %v4530_v46 = vrot.slane %v4529_v38, 1  ;;  %v4536_v26 = vadd.f32 %v4535_v40, %v4534_v35 }
 0x4e1   : > { %v4517_v39 = vadd.f32 %v4516_v41, %v4515_v36  ;;  %v4523_v48 = vrot.slane %v4522_v45, 1  ;;  %v4531_v61 = vadd.f32 %v4530_v46, %v4529_v38  ;;  %v4537_v5 = vrot.slane %v4536_v26, 1 }
 0x4e3   : > { %v4524_v18 = vadd.f32 %v4523_v48, %v4522_v45  ;;  %v4538_v28 = vadd.f32 %v4537_v5, %v4536_v26  ;;  %v4417_v26 = vld [vmem:[%s6186_s18 + $0x30] sm:$0xff]  ;;  %v4418_v48 = vld [vmem:[%s6186_s18 + $0x38] sm:$0xff]  ;;  %s5278_s18 = scalar_lea.vmem %s6240_s13, 256 }
 0x4e4   : > { %p5279_p0 = scmp.ne.s32.totalorder %s6240_s13, %s5278_s18  ;;  %p5286_p5 = scmp.lt.s32.totalorder %s5284_s23, %s5278_s18 }
 0x4e5   : > { %v4613_v42 = vcombine.low %v4517_v39, %v4524_v18  ;;  %v4614_v52 = vcombine.low %v4531_v61, %v4538_v28 }
 0x4e6   : > { %p5280_p1 = pnand %p5279_p0, %p5468_p3  ;;  %p5287_p6 = por %p5286_p5, %p5285_p4 }
 0x4e7   : > { %v4635_v3 = vrot.slane %v4613_v42, %v6194_v62  ;;  %v4642_v13 = vrot.slane %v4614_v52, %v6194_v62 }
 0x4e8   : > { %p5281_p2 = pneg %p5280_p1 }
 0x4e9   : > { %v4644_v47 = vcombine.low %v4635_v3, %v4642_v13 }
 0x4ea   : > { %p5288_p7 = pnand %p5287_p6, %p5281_p2 }
 0x4eb   : > { %v4658_v50 = vrot.slane %v4644_v47, %v6194_v62 }
 0x4ed   : > { %v4659_v51 = vcombine.low %v4651_v49, %v4658_v50 }
 0x4ef   : > { %4711 = vst [vmem:[%s6211_s22] sm:$0xff] %v4659_v51 }
 0x500   : > { %v4193_v29 = vpop.f32.mrb[164].mxu0  ;;  %v4264_v53 = vpop.f32.mrb[164].mxu1 }
 0x501   : > { %v4195_v54 = vpop.f32.mrb[165].mxu0  ;;  %v4266_v56 = vpop.f32.mrb[165].mxu1 }
 0x502   : > { %v4439_v58 = vcombine.low %v4193_v29, %v4195_v54  ;;  %v4440_v59 = vcombine.low %v4264_v53, %v4266_v56 }
 0x504   : > { %v4455_v60 = vmul.f32 %v4439_v58, %v4415_v55  ;;  %v4456_v63 = vmul.f32 %v4440_v59, %v4416_v57 }
 0x506   : > { %v4471_v43 = vcombine.high %v4455_v60, %v4455_v60  ;;  %v4539_v44 = vsel %vm3205_vm4, %v4455_v60, 0.0  ;;  %v4472_v1 = vcombine.high %v4456_v63, %v4456_v63  ;;  %v4553_v7 = vsel %vm3205_vm4, %v4456_v63, 0.0 }
 0x507   : > { %v4540_v8 = vrot.slane %v4539_v44, 4  ;;  %v4554_v9 = vrot.slane %v4553_v7, 4 }
 0x508   : > { %v4546_v10 = vsel %vm3205_vm4, %v4471_v43, 0.0  ;;  %v4560_v11 = vsel %vm3205_vm4, %v4472_v1, 0.0 }
 0x509   : > { %v4541_v12 = vadd.f32 %v4540_v8, %v4539_v44  ;;  %v4547_v14 = vrot.slane %v4546_v10, 4  ;;  %v4555_v15 = vadd.f32 %v4554_v9, %v4553_v7  ;;  %v4561_v4 = vrot.slane %v4560_v11, 4 }
 0x50b   : > { %v4542_v6 = vrot.slane %v4541_v12, 2  ;;  %v4548_v16 = vadd.f32 %v4547_v14, %v4546_v10  ;;  %v4556_v17 = vrot.slane %v4555_v15, 2  ;;  %v4562_v19 = vadd.f32 %v4561_v4, %v4560_v11 }
 0x50d   : > { %v4543_v20 = vadd.f32 %v4542_v6, %v4541_v12  ;;  %v4549_v21 = vrot.slane %v4548_v16, 2  ;;  %v4557_v0 = vadd.f32 %v4556_v17, %v4555_v15  ;;  %v4563_v22 = vrot.slane %v4562_v19, 2 }
 0x50f   : > { %v4544_v23 = vrot.slane %v4543_v20, 1  ;;  %v4550_v24 = vadd.f32 %v4549_v21, %v4548_v16  ;;  %v4558_v25 = vrot.slane %v4557_v0, 1  ;;  %v4564_v27 = vadd.f32 %v4563_v22, %v4562_v19 }
 0x511   : > { %v4545_v30 = vadd.f32 %v4544_v23, %v4543_v20  ;;  %v4551_v2 = vrot.slane %v4550_v24, 1  ;;  %v4559_v31 = vadd.f32 %v4558_v25, %v4557_v0  ;;  %v4565_v32 = vrot.slane %v4564_v27, 1 }
 0x513   : > { %v4552_v33 = vadd.f32 %v4551_v2, %v4550_v24  ;;  %v4566_v34 = vadd.f32 %v4565_v32, %v4564_v27 }
 0x515   : > { %v4660_v35 = vcombine.low %v4545_v30, %v4552_v33  ;;  %v4661_v36 = vcombine.low %v4559_v31, %v4566_v34 }
 0x517   : > { %v4670_v37 = vrot.slane %v4660_v35, %v6194_v62  ;;  %v4677_v38 = vrot.slane %v4661_v36, %v6194_v62 }
 0x519   : > { %v4692_v40 = vcombine.low %v4670_v37, %v4677_v38 }
 0x51b   : > { %v4700_v21 = vrot.slane %v4692_v40, %v6194_v62 }
 0x530   : > { %v4335_v41 = vpop.f32.mrb[166].mxu0  ;;  %v4406_v45 = vpop.f32.mrb[166].mxu1 }
 0x531   : > { %v4337_v46 = vpop.f32.mrb[167].mxu0  ;;  %v4408_v39 = vpop.f32.mrb[167].mxu1 }
 0x532   : > { %v4441_v61 = vcombine.low %v4335_v41, %v4337_v46  ;;  %v4442_v5 = vcombine.low %v4406_v45, %v4408_v39 }
 0x534   : > { %v4457_v18 = vmul.f32 %v4441_v61, %v4417_v26  ;;  %v4458_v28 = vmul.f32 %v4442_v5, %v4418_v48 }
 0x536   : > { %v4473_v42 = vcombine.high %v4457_v18, %v4457_v18  ;;  %v4567_v52 = vsel %vm3205_vm4, %v4457_v18, 0.0  ;;  %v4474_v3 = vcombine.high %v4458_v28, %v4458_v28  ;;  %v4581_v13 = vsel %vm3205_vm4, %v4458_v28, 0.0 }
 0x537   : > { %v4568_v47 = vrot.slane %v4567_v52, 4  ;;  %v4582_v49 = vrot.slane %v4581_v13, 4 }
 0x538   : > { %v4574_v50 = vsel %vm3205_vm4, %v4473_v42, 0.0  ;;  %v4588_v51 = vsel %vm3205_vm4, %v4474_v3, 0.0 }
 0x539   : > { %v4569_v29 = vadd.f32 %v4568_v47, %v4567_v52  ;;  %v4575_v53 = vrot.slane %v4574_v50, 4  ;;  %v4583_v54 = vadd.f32 %v4582_v49, %v4581_v13  ;;  %v4589_v55 = vrot.slane %v4588_v51, 4 }
 0x53b   : > { %v4570_v56 = vrot.slane %v4569_v29, 2  ;;  %v4576_v57 = vadd.f32 %v4575_v53, %v4574_v50  ;;  %v4584_v58 = vrot.slane %v4583_v54, 2  ;;  %v4590_v59 = vadd.f32 %v4589_v55, %v4588_v51 }
 0x53d   : > { %v4571_v60 = vadd.f32 %v4570_v56, %v4569_v29  ;;  %v4577_v63 = vrot.slane %v4576_v57, 2  ;;  %v4585_v43 = vadd.f32 %v4584_v58, %v4583_v54  ;;  %v4591_v44 = vrot.slane %v4590_v59, 2 }
 0x53f   : > { %v4572_v1 = vrot.slane %v4571_v60, 1  ;;  %v4578_v7 = vadd.f32 %v4577_v63, %v4576_v57  ;;  %v4586_v8 = vrot.slane %v4585_v43, 1  ;;  %v4592_v9 = vadd.f32 %v4591_v44, %v4590_v59 }
 0x541   : > { %v4579_v10 = vrot.slane %v4578_v7, 1  ;;  %v4593_v11 = vrot.slane %v4592_v9, 1  ;;  %v4573_v12 = vadd.f32 %v4572_v1, %v4571_v60  ;;  %v4587_v15 = vadd.f32 %v4586_v8, %v4585_v43 }
 0x543   : > { %v4580_v14 = vadd.f32 %v4579_v10, %v4578_v7  ;;  %v4594_v4 = vadd.f32 %v4593_v11, %v4592_v9 }
 0x545   : > { %v4662_v6 = vcombine.low %v4573_v12, %v4580_v14  ;;  %v4663_v16 = vcombine.low %v4587_v15, %v4594_v4 }
 0x547   : > { %v4684_v17 = vrot.slane %v4662_v6, %v6194_v62  ;;  %v4691_v19 = vrot.slane %v4663_v16, %v6194_v62 }
 0x549   : > { %v4693_v20 = vcombine.low %v4684_v17, %v4691_v19 }
 0x54b   : > { %v4707_v0 = vrot.slane %v4693_v20, %v6194_v62 }
 0x54d   : > { %v4708_v22 = vcombine.low %v4700_v21, %v4707_v0 }
 0x54f   : > { %4712 = vst [vmem:[%s6211_s22 + $0x8] sm:$0xff] %v4708_v22 }
 0x550   : > { %5291 = shalt.err (!%p5288_p7)
}
 0x551   : > { %s5292_s9 = scalar_lea.hbm %s6238_s28, 256  ;;  %s5296_s27 = scalar_lea.hbm %s6301_s7, 1024 }
 0x552   : > { %p5293_p9 = scmp.ne.s32.totalorder %s6238_s28, %s5292_s9  ;;  %p5297_p12 = scmp.lt.u32.totalorder %s6238_s28, %s6301_s7 }
 0x553   : > { %p5298_p13 = scmp.lt.u32.totalorder %s5296_s27, %s5292_s9  ;;  %p5300_p1 = scmp.lt.u32.totalorder %s5292_s9, %s6238_s28 }
 0x554   : > { %p5294_p10 = pnand %p5293_p9, %p5468_p3 }
 0x555   : > { %p5299_p0 = por %p5298_p13, %p5297_p12 }
 0x556   : > { %p5295_p11 = pneg %p5294_p10 }
 0x557   : > { %p5301_p2 = por %p5300_p1, %p5299_p0 }
 0x559   : > { %p5302_p4 = pnand %p5301_p2, %p5295_p11 }
 0x55b   : > { %5305 = shalt.err (!%p5302_p4)
}
 0x55c   : > { %5205 = dma.vmem_to_hbm [thread:$0]  (%p5468_p3), %s6240_s13, 256, %s6238_s28, %s4714_s20  }
 0x55d PF: > { %p5211_p5 = scmp.ge.s32.totalorder %s5372_s8, 2  ;;  %s4742_s18 = sand.u32 1, %s5344_s24  }
 0x55e   : > { %s4743_s16 = scalar_lea.sflag [#allocation3], %s4742_s18 }
 0x55f   : > { %p5208_p6 = pnand %p5211_p5, %p5477_p8 }
 0x561   : > { %5339 = dma.done.wait (!%p5208_p6), %s4743_s16, 256  }
 0x562   : > { %5341 = vsyncadd (!%p5208_p6), %s4743_s16, 4294967040  ;;  %s20_s8 = sadd.s32 1, %s5372_s8   ;;  %s6304_s24 = smov %s5348_s25 }
 0x563   : > { %p17_p7 = scmp.ge.s32.totalorder %s20_s8, 6   ;;  %s6305_s25 = smov %s5352_s26 }
 0x564   : > { %s6306_s26 = smov %s5486_s19  ;;  %s6307_s27 = smov %s5364_s29 }
 0x565   : > { %s6308_s28 = smov %s5368_s30  ;;  %s6309_s29 = smov %s6312_s11 }
 0x566   : > { %s6310_s30 = smov %s6316_s12  ;;  %19 = sbr.rel (!%p17_p7) target bundleno = 5 (0x5), region = 86 }
 0x56d   :  { %4748 = vsyncpa [#allocation3], 1 }
 0x56e   :  { %4750 = vsyncpa [#allocation3 + $0x1], 1 }

</bundles_post_ra>
